<compile_context>
chip_gen: v5e
topology: v5e:2x2
jax: 0.10.0
libtpu: 0.0.40
codegen_flags: <defaults>
</compile_context>

<pallas_src>
import functools

import numpy as np
import jax
import jax.numpy as jnp
from jax.experimental import pallas as pl
from jax.experimental.pallas import tpu as pltpu


def _pt_transformer_kernel(K, N, TN, D, GJ, scale,
                           feat_ref, qg_ref, idx_ref, rel_ref, rhs_ref,
                           wd1_ref, bd1_ref, wd12_ref, bd2c_ref,
                           wg2_ref, bg2_ref, w2_ref, b2_ref,
                           res_ref, attn_ref, vp_ref):
    f32 = jnp.float32
    bf16 = jnp.bfloat16

    def mm(a, b):  # bf16 MXU matmul, f32 accumulation
        return jnp.dot(a.astype(bf16), b.astype(bf16), preferred_element_type=f32)

    idx = idx_ref[0]                     # (TN, K)    int32 neighbour ids
    rel = rel_ref[0]                     # (TN, K*3)  f32  xyz[i] - xyz[idx[i, j]]
    qg = qg_ref[0]                       # (TN, D)    f32  q @ Wg1 + bg1 (hoisted)
    rhs = rhs_ref[0]                     # (N, 2D)    bf16 [keys@Wg1 | vals] (hoisted)

    iota_n = jax.lax.broadcasted_iota(jnp.int32, (1, N), 1)   # (1, N), broadcast in compare
    wd1 = wd1_ref[...]                   # (3, D)  f32  (VPU path)
    bd1 = bd1_ref[...]                   # (1, D)
    bd2c = bd2c_ref[...]                 # (1, 2D) = [bd2 | bd2@Wg1]

    # q-projection replicated across the GJ neighbour sub-blocks (hoisted out of the loop)
    qg_rep = qg if GJ == 1 else jnp.concatenate([qg] * GJ, axis=0)     # (GJ*TN, D)

    m = jnp.full((TN, D), -jnp.inf, f32)

    # ---- pass 1: batched gather + logits -> attn_ref, (v + pos) -> bf16 scratch ----
    # NOTE: for K much larger than ~16, switch these unrolled loops to
    # lax.fori_loop(..., unroll=2-4) to cap vreg live ranges.
    for j0 in range(0, K, GJ):
        # One-hot for GJ neighbours stacked along sublanes (built in-register; exact in bf16).
        oh = jnp.concatenate(
            [jnp.where(idx[:, j:j + 1] == iota_n, 1.0, 0.0).astype(bf16)
             for j in range(j0, j0 + GJ)], axis=0)                     # (GJ*TN, N)
        g = mm(oh, rhs)                                                # fused gather (GJ*TN, 2D)
        kg = g[:, 0:D]                                                 # gather(keys @ Wg1)
        vg = g[:, D:2 * D]                                             # gather(vals)

        # fc_delta layer 1 on the VPU (contraction depth 3), for the whole group.
        r3 = jnp.concatenate(
            [rel[:, 3 * j:3 * j + 3] for j in range(j0, j0 + GJ)], axis=0)   # (GJ*TN, 3)
        h = jnp.maximum(r3[:, 0:1] * wd1[0:1, :]
                        + r3[:, 1:2] * wd1[1:2, :]
                        + r3[:, 2:3] * wd1[2:3, :] + bd1, 0.0)

        # fc_delta layer 2 fused with pos@Wg1:  h @ [Wd2 | Wd2@Wg1] + [bd2 | bd2@Wg1]
        pg = mm(h, wd12_ref[...]) + bd2c                               # (GJ*TN, 2D)
        pos = pg[:, 0:D]
        pos_g = pg[:, D:2 * D]

        # fc_gamma: (q - k + pos) @ Wg1 + bg1 == qg - kg + pos_g
        h2 = jnp.maximum(qg_rep - kg + pos_g, 0.0)
        logits = (mm(h2, wg2_ref[...]) + bg2_ref[...]) * scale         # (GJ*TN, D)

        vp_ref[j0:j0 + GJ] = (vg + pos).astype(bf16).reshape(GJ, TN, D)
        for jj in range(GJ):
            lj = logits[jj * TN:(jj + 1) * TN]
            attn_ref[0, :, (j0 + jj) * D:(j0 + jj + 1) * D] = lj       # stash logits
            m = jnp.maximum(m, lj)

    # ---- pass 2: exp cached in attn_ref + softmax denominator ----
    s = jnp.zeros((TN, D), f32)
    for j in range(K):
        e = jnp.exp(attn_ref[0, :, j * D:(j + 1) * D] - m)
        attn_ref[0, :, j * D:(j + 1) * D] = e
        s = s + e
    inv_s = pl.reciprocal(s, approx=True)

    # ---- pass 3: normalise + weighted aggregation ----
    agg = jnp.zeros((TN, D), f32)
    for j in range(K):
        a = attn_ref[0, :, j * D:(j + 1) * D] * inv_s
        attn_ref[0, :, j * D:(j + 1) * D] = a
        agg = agg + a * vp_ref[j].astype(f32)

    # fc2 + residual
    res_ref[0] = (mm(agg, w2_ref[...]) + b2_ref[...] + feat_ref[0]).astype(res_ref.dtype)


def _const_index_map(ndim):
    return lambda b, t: (0,) * ndim


def _vmem_limit_bytes():
    try:
        cap = int(pltpu.get_tpu_info().vmem_capacity_bytes)
        return min(cap * 3 // 4, 96 * 1024 * 1024)
    except Exception:
        return 48 * 1024 * 1024


def _pick_query_tile(N):
    # TN = 256 on 64 MiB-VMEM parts (v7x), 512 on 128 MiB parts (v5e / v6e).
    try:
        vmem = int(pltpu.get_tpu_info().vmem_capacity_bytes)
    except Exception:
        vmem = 64 * 1024 * 1024
    target = 256 if vmem <= (64 << 20) else 512
    return N if N <= target else target


def pt_transformer_block(xyz, feat, params, K):
    """xyz: (B, N, 3) f32, feat: (B, N, d_points) f32. Returns (res, attn, knn_idx)."""
    B, N, _ = xyz.shape
    P = feat.shape[-1]
    D = params["wq"].shape[0]
    bf16 = jnp.bfloat16

    # --- kNN (glue, plain JAX): ||x||^2 + ||y||^2 - 2 x.y^T, then top-k ---
    # TODO(synk): top-k neighbour selection has no clean Pallas TPU primitive.
    sq = jnp.sum(xyz * xyz, axis=-1)
    d2 = sq[:, :, None] + sq[:, None, :] - 2.0 * jnp.einsum("bnd,bmd->bnm", xyz, xyz)
    _, knn_idx = jax.lax.top_k(-d2, K)                                   # (B, N, K)
    knn_idx = knn_idx.astype(jnp.int32)

    # Relative positions (tiny) computed once outside the kernel, exact f32.
    knn_xyz = jax.vmap(lambda a, ii: a[ii])(xyz, knn_idx)                # (B, N, K, 3)
    rel = (xyz[:, :, None, :] - knn_xyz).reshape(B, N, K * 3)

    # --- hoisted full-N projections (computed ONCE per batch, not per query tile) ---
    x = feat @ params["w1"] + params["b1"]                               # (B, N, D) f32
    rhs = jnp.concatenate([x @ (params["wk"] @ params["wg1"]),
                           x @ params["wv"]], axis=-1).astype(bf16)      # (B, N, 2D) bf16
    qg = x @ (params["wq"] @ params["wg1"]) + params["bg1"]              # (B, N, D) f32

    # Fused fc_delta layer-2 + pos@Wg1 weights.
    wd12 = jnp.concatenate([params["wd2"], params["wd2"] @ params["wg1"]],
                           axis=1).astype(bf16)                          # (D, 2D)
    bd2c = jnp.concatenate([params["bd2"], params["bd2"] @ params["wg1"]], axis=1)

    # --- tiling: tile the query dim, pad N up to a multiple of TN if needed ---
    TN = _pick_query_tile(N)
    NT = pl.cdiv(N, TN)
    Np = NT * TN
    if Np != N:
        pad = ((0, 0), (0, Np - N), (0, 0))
        feat_in = jnp.pad(feat, pad)
        qg_in = jnp.pad(qg, pad)
        idx_in = jnp.pad(knn_idx, pad)         # padded rows gather row 0 (valid, discarded)
        rel_in = jnp.pad(rel, pad)
    else:
        feat_in, qg_in, idx_in, rel_in = feat, qg, knn_idx, rel

    # Neighbour group size: batch GJ neighbours per gather matmul (GJ*TN <= 1024 rows).
    gj_cap = max(1, 1024 // TN)
    GJ = 1
    for g in range(1, K + 1):
        if K % g == 0 and g <= gj_cap:
            GJ = g

    param_list = [
        params["wd1"], params["bd1"],                    # fc_delta layer-1 (VPU path, f32)
        wd12, bd2c,                                      # fused fc_delta-2 / pos@Wg1
        params["wg2"].astype(bf16), params["bg2"],       # fc_gamma layer-2
        params["w2"].astype(bf16), params["b2"],         # fc2
    ]

    in_specs = [
        pl.BlockSpec((1, TN, P), lambda b, t: (b, t, 0)),         # feat tile (residual)
        pl.BlockSpec((1, TN, D), lambda b, t: (b, t, 0)),         # q @ Wg1 + bg1 tile
        pl.BlockSpec((1, TN, K), lambda b, t: (b, t, 0)),         # kNN indices tile
        pl.BlockSpec((1, TN, 3 * K), lambda b, t: (b, t, 0)),     # rel positions tile
        pl.BlockSpec((1, N, 2 * D), lambda b, t: (b, 0, 0)),      # gather source (per batch)
    ] + [pl.BlockSpec(p.shape, _const_index_map(p.ndim)) for p in param_list]

    out_specs = (
        pl.BlockSpec((1, TN, P), lambda b, t: (b, t, 0)),
        pl.BlockSpec((1, TN, K * D), lambda b, t: (b, t, 0)),     # lane-dense attn slab
    )
    out_shape = (
        jax.ShapeDtypeStruct((B, Np, P), jnp.float32),
        jax.ShapeDtypeStruct((B, Np, K * D), jnp.float32),
    )

    kern = functools.partial(_pt_transformer_kernel, K, N, TN, D, GJ,
                             float(1.0 / np.sqrt(D)))
    res, attn_flat = pl.pallas_call(
        kern,
        grid=(B, NT),
        in_specs=in_specs,
        out_specs=out_specs,
        out_shape=out_shape,
        scratch_shapes=[pltpu.VMEM((K, TN, D), jnp.bfloat16)],    # v + pos (bf16 halves VMEM)
        compiler_params=pltpu.CompilerParams(
            dimension_semantics=("parallel", "parallel"),
            vmem_limit_bytes=_vmem_limit_bytes()),
    )(feat_in, qg_in, idx_in, rel_in, rhs, *param_list)

    if Np != N:
        res = res[:, :N]
        attn_flat = attn_flat[:, :N]
    # (B, N, K*D) -> (B, N, K, D): free minor-dim split, matches the PyTorch layout.
    attn = attn_flat.reshape(B, N, K, D)
    return res, attn, knn_idx


def init_params(key, d_points, d_model):
    keys = jax.random.split(key, 15)

    def lin(kk, fan_in, shape):
        bound = 1.0 / np.sqrt(fan_in)
        return jax.random.uniform(kk, shape, jnp.float32, -bound, bound)

    p = {}
    p["w1"] = lin(keys[0], d_points, (d_points, d_model))
    p["b1"] = lin(keys[1], d_points, (1, d_model))
    p["wq"] = lin(keys[2], d_model, (d_model, d_model))
    p["wk"] = lin(keys[3], d_model, (d_model, d_model))
    p["wv"] = lin(keys[4], d_model, (d_model, d_model))
    p["wd1"] = lin(keys[5], 3, (3, d_model))
    p["bd1"] = lin(keys[6], 3, (1, d_model))
    p["wd2"] = lin(keys[7], d_model, (d_model, d_model))
    p["bd2"] = lin(keys[8], d_model, (1, d_model))
    p["wg1"] = lin(keys[9], d_model, (d_model, d_model))
    p["bg1"] = lin(keys[10], d_model, (1, d_model))
    p["wg2"] = lin(keys[11], d_model, (d_model, d_model))
    p["bg2"] = lin(keys[12], d_model, (1, d_model))
    p["w2"] = lin(keys[13], d_model, (d_model, d_points))
    p["b2"] = lin(keys[14], d_model, (1, d_points))
    return p


def reference(xyz, feat, params, knn_idx):
    """Pure-JAX f32 reference mirroring the PyTorch _forward (same knn_idx)."""
    D = params["wq"].shape[0]
    gather = jax.vmap(lambda a, ii: a[ii])
    knn_xyz = gather(xyz, knn_idx)                                    # (B,N,K,3)
    x = feat @ params["w1"] + params["b1"]
    q = x @ params["wq"]
    keys = x @ params["wk"]
    vals = x @ params["wv"]
    k_g = gather(keys, knn_idx)
    v_g = gather(vals, knn_idx)
    rel = xyz[:, :, None, :] - knn_xyz
    pos = jnp.maximum(rel @ params["wd1"] + params["bd1"], 0.0) @ params["wd2"] + params["bd2"]
    gin = q[:, :, None, :] - k_g + pos
    logits = (jnp.maximum(gin @ params["wg1"] + params["bg1"], 0.0)
              @ params["wg2"] + params["bg2"]) / np.sqrt(D)
    attn = jax.nn.softmax(logits, axis=-2)
    res = jnp.einsum("bnkd,bnkd->bnd", attn, v_g + pos)
    res = res @ params["w2"] + params["b2"] + feat
    return res, attn


if __name__ == "__main__":
    B, N, d_points, d_model, K = 2, 16, 8, 32, 4
    key = jax.random.PRNGKey(0)
    kx, kf, kp = jax.random.split(key, 3)
    xyz = jax.random.normal(kx, (B, N, 3), jnp.float32)
    feat = jax.random.normal(kf, (B, N, d_points), jnp.float32)
    params = init_params(kp, d_points, d_model)

    res, attn, knn_idx = pt_transformer_block(xyz, feat, params, K)
    res = jax.block_until_ready(res)
    attn = jax.block_until_ready(attn)

    assert res.shape == (B, N, d_points)
    assert attn.shape == (B, N, K, d_model)

    res_ref, attn_ref = reference(xyz, feat, params, knn_idx)
    np.testing.assert_allclose(np.asarray(res), np.asarray(res_ref), rtol=2e-2, atol=2e-2)
    np.testing.assert_allclose(np.asarray(attn), np.asarray(attn_ref), rtol=2e-2, atol=2e-2)

    print("KERNEL_OK")
</pallas_src>

<mosaic_0001>
module attributes {stable_mosaic.version = 11 : i64} {
  func.func @_pt_transformer_kernel(%arg0: i32, %arg1: i32, %arg2: memref<1x16x8xf32, #tpu.memory_space<vmem>>, %arg3: memref<1x16x32xf32, #tpu.memory_space<vmem>>, %arg4: memref<1x16x4xi32, #tpu.memory_space<vmem>>, %arg5: memref<1x16x12xf32, #tpu.memory_space<vmem>>, %arg6: memref<1x16x64xbf16, #tpu.memory_space<vmem>>, %arg7: memref<3x32xf32, #tpu.memory_space<vmem>>, %arg8: memref<1x32xf32, #tpu.memory_space<vmem>>, %arg9: memref<32x64xbf16, #tpu.memory_space<vmem>>, %arg10: memref<1x64xf32, #tpu.memory_space<vmem>>, %arg11: memref<32x32xbf16, #tpu.memory_space<vmem>>, %arg12: memref<1x32xf32, #tpu.memory_space<vmem>>, %arg13: memref<32x8xbf16, #tpu.memory_space<vmem>>, %arg14: memref<1x8xf32, #tpu.memory_space<vmem>>, %arg15: memref<1x16x8xf32, #tpu.memory_space<vmem>>, %arg16: memref<1x16x128xf32, #tpu.memory_space<vmem>>, %arg17: memref<4x16x32xbf16, #tpu.memory_space<vmem>>) attributes {dimension_semantics = [#tpu.dimension_semantics<parallel>, #tpu.dimension_semantics<parallel>], iteration_bounds = array<i64: 2, 1>, scalar_prefetch = 0 : i64, scratch_operands = 1 : i64, tpu.core_type = #tpu.core_type<tc>, window_params = [{transform_indices = @transform_0, window_bounds = array<i64: 1, 16, 8>}, {transform_indices = @transform_1, window_bounds = array<i64: 1, 16, 32>}, {transform_indices = @transform_2, window_bounds = array<i64: 1, 16, 4>}, {transform_indices = @transform_3, window_bounds = array<i64: 1, 16, 12>}, {transform_indices = @transform_4, window_bounds = array<i64: 1, 16, 64>}, {pipeline_mode = #tpu.pipeline_mode<synchronous>, transform_indices = @transform_5, window_bounds = array<i64: 3, 32>}, {pipeline_mode = #tpu.pipeline_mode<synchronous>, transform_indices = @transform_6, window_bounds = array<i64: 1, 32>}, {pipeline_mode = #tpu.pipeline_mode<synchronous>, transform_indices = @transform_7, window_bounds = array<i64: 32, 64>}, {pipeline_mode = #tpu.pipeline_mode<synchronous>, transform_indices = @transform_8, window_bounds = array<i64: 1, 64>}, {pipeline_mode = #tpu.pipeline_mode<synchronous>, transform_indices = @transform_9, window_bounds = array<i64: 32, 32>}, {pipeline_mode = #tpu.pipeline_mode<synchronous>, transform_indices = @transform_10, window_bounds = array<i64: 1, 32>}, {pipeline_mode = #tpu.pipeline_mode<synchronous>, transform_indices = @transform_11, window_bounds = array<i64: 32, 8>}, {pipeline_mode = #tpu.pipeline_mode<synchronous>, transform_indices = @transform_12, window_bounds = array<i64: 1, 8>}, {transform_indices = @transform_13, window_bounds = array<i64: 1, 16, 8>}, {transform_indices = @transform_14, window_bounds = array<i64: 1, 16, 128>}]} {
    %c0 = arith.constant 0 : index
    %c0_0 = arith.constant 0 : index
    %c0_1 = arith.constant 0 : index
    %0 = vector.load %arg4[%c0, %c0_0, %c0_1] : memref<1x16x4xi32, #tpu.memory_space<vmem>>, vector<1x16x4xi32>
    %1 = vector.shape_cast %0 : vector<1x16x4xi32> to vector<16x4xi32>
    %c0_2 = arith.constant 0 : index
    %c0_3 = arith.constant 0 : index
    %c0_4 = arith.constant 0 : index
    %2 = vector.load %arg5[%c0_2, %c0_3, %c0_4] : memref<1x16x12xf32, #tpu.memory_space<vmem>>, vector<1x16x12xf32>
    %3 = vector.shape_cast %2 : vector<1x16x12xf32> to vector<16x12xf32>
    %c0_5 = arith.constant 0 : index
    %c0_6 = arith.constant 0 : index
    %c0_7 = arith.constant 0 : index
    %4 = vector.load %arg3[%c0_5, %c0_6, %c0_7] : memref<1x16x32xf32, #tpu.memory_space<vmem>>, vector<1x16x32xf32>
    %5 = vector.shape_cast %4 : vector<1x16x32xf32> to vector<16x32xf32>
    %c0_8 = arith.constant 0 : index
    %c0_9 = arith.constant 0 : index
    %c0_10 = arith.constant 0 : index
    %6 = vector.load %arg6[%c0_8, %c0_9, %c0_10] : memref<1x16x64xbf16, #tpu.memory_space<vmem>>, vector<1x16x64xbf16>
    %7 = vector.shape_cast %6 : vector<1x16x64xbf16> to vector<16x64xbf16>
    %8 = tpu.iota {dimensions = array<i32: 1>} : vector<1x16xi32>
    %c0_11 = arith.constant 0 : index
    %c0_12 = arith.constant 0 : index
    %9 = vector.load %arg7[%c0_11, %c0_12] : memref<3x32xf32, #tpu.memory_space<vmem>>, vector<3x32xf32>
    %c0_13 = arith.constant 0 : index
    %c0_14 = arith.constant 0 : index
    %10 = vector.load %arg8[%c0_13, %c0_14] : memref<1x32xf32, #tpu.memory_space<vmem>>, vector<1x32xf32>
    %c0_15 = arith.constant 0 : index
    %c0_16 = arith.constant 0 : index
    %11 = vector.load %arg10[%c0_15, %c0_16] : memref<1x64xf32, #tpu.memory_space<vmem>>, vector<1x64xf32>
    %12 = tpu.concatenate %5, %5, %5, %5 in 0 : vector<16x32xf32>, vector<16x32xf32>, vector<16x32xf32>, vector<16x32xf32> -> vector<64x32xf32>
    %cst = arith.constant 0xFF800000 : f32
    %13 = vector.broadcast %cst : f32 to vector<16x32xf32>
    %14 = vector.extract_strided_slice %1 {offsets = [0, 0], sizes = [16, 1], strides = [1, 1]} : vector<16x4xi32> to vector<16x1xi32>
    %15 = vector.broadcast %14 : vector<16x1xi32> to vector<16x16xi32>
    %16 = vector.broadcast %8 : vector<1x16xi32> to vector<16x16xi32>
    %17 = arith.cmpi eq, %15, %16 : vector<16x16xi32>
    %cst_17 = arith.constant 1.000000e+00 : f32
    %cst_18 = arith.constant 0.000000e+00 : f32
    %18 = vector.broadcast %cst_17 : f32 to vector<16x16xf32>
    %19 = vector.broadcast %cst_18 : f32 to vector<16x16xf32>
    %20 = arith.select %17, %18, %19 : vector<16x16xi1>, vector<16x16xf32>
    %21 = arith.truncf %20 : vector<16x16xf32> to vector<16x16xbf16>
    %22 = vector.extract_strided_slice %1 {offsets = [0, 1], sizes = [16, 1], strides = [1, 1]} : vector<16x4xi32> to vector<16x1xi32>
    %23 = vector.broadcast %22 : vector<16x1xi32> to vector<16x16xi32>
    %24 = vector.broadcast %8 : vector<1x16xi32> to vector<16x16xi32>
    %25 = arith.cmpi eq, %23, %24 : vector<16x16xi32>
    %cst_19 = arith.constant 1.000000e+00 : f32
    %cst_20 = arith.constant 0.000000e+00 : f32
    %26 = vector.broadcast %cst_19 : f32 to vector<16x16xf32>
    %27 = vector.broadcast %cst_20 : f32 to vector<16x16xf32>
    %28 = arith.select %25, %26, %27 : vector<16x16xi1>, vector<16x16xf32>
    %29 = arith.truncf %28 : vector<16x16xf32> to vector<16x16xbf16>
    %30 = vector.extract_strided_slice %1 {offsets = [0, 2], sizes = [16, 1], strides = [1, 1]} : vector<16x4xi32> to vector<16x1xi32>
    %31 = vector.broadcast %30 : vector<16x1xi32> to vector<16x16xi32>
    %32 = vector.broadcast %8 : vector<1x16xi32> to vector<16x16xi32>
    %33 = arith.cmpi eq, %31, %32 : vector<16x16xi32>
    %cst_21 = arith.constant 1.000000e+00 : f32
    %cst_22 = arith.constant 0.000000e+00 : f32
    %34 = vector.broadcast %cst_21 : f32 to vector<16x16xf32>
    %35 = vector.broadcast %cst_22 : f32 to vector<16x16xf32>
    %36 = arith.select %33, %34, %35 : vector<16x16xi1>, vector<16x16xf32>
    %37 = arith.truncf %36 : vector<16x16xf32> to vector<16x16xbf16>
    %38 = vector.extract_strided_slice %1 {offsets = [0, 3], sizes = [16, 1], strides = [1, 1]} : vector<16x4xi32> to vector<16x1xi32>
    %39 = vector.broadcast %38 : vector<16x1xi32> to vector<16x16xi32>
    %40 = vector.broadcast %8 : vector<1x16xi32> to vector<16x16xi32>
    %41 = arith.cmpi eq, %39, %40 : vector<16x16xi32>
    %cst_23 = arith.constant 1.000000e+00 : f32
    %cst_24 = arith.constant 0.000000e+00 : f32
    %42 = vector.broadcast %cst_23 : f32 to vector<16x16xf32>
    %43 = vector.broadcast %cst_24 : f32 to vector<16x16xf32>
    %44 = arith.select %41, %42, %43 : vector<16x16xi1>, vector<16x16xf32>
    %45 = arith.truncf %44 : vector<16x16xf32> to vector<16x16xbf16>
    %46 = tpu.concatenate %21, %29, %37, %45 in 0 : vector<16x16xbf16>, vector<16x16xbf16>, vector<16x16xbf16>, vector<16x16xbf16> -> vector<64x16xbf16>
    %cst_25 = arith.constant dense<0.000000e+00> : vector<64x64xf32>
    %47 = tpu.matmul %46, %7, %cst_25 {dimension_numbers = #tpu.dot_dimension_numbers<[1], [0], [0], [1], [0, 0, 1, 1], [], []>} : vector<64x16xbf16>, vector<16x64xbf16>, vector<64x64xf32> -> vector<64x64xf32>
    %48 = vector.extract_strided_slice %47 {offsets = [0, 0], sizes = [64, 32], strides = [1, 1]} : vector<64x64xf32> to vector<64x32xf32>
    %49 = vector.extract_strided_slice %47 {offsets = [0, 32], sizes = [64, 32], strides = [1, 1]} : vector<64x64xf32> to vector<64x32xf32>
    %50 = vector.extract_strided_slice %3 {offsets = [0, 0], sizes = [16, 3], strides = [1, 1]} : vector<16x12xf32> to vector<16x3xf32>
    %51 = vector.extract_strided_slice %3 {offsets = [0, 3], sizes = [16, 3], strides = [1, 1]} : vector<16x12xf32> to vector<16x3xf32>
    %52 = vector.extract_strided_slice %3 {offsets = [0, 6], sizes = [16, 3], strides = [1, 1]} : vector<16x12xf32> to vector<16x3xf32>
    %53 = vector.extract_strided_slice %3 {offsets = [0, 9], sizes = [16, 3], strides = [1, 1]} : vector<16x12xf32> to vector<16x3xf32>
    %54 = tpu.concatenate %50, %51, %52, %53 in 0 : vector<16x3xf32>, vector<16x3xf32>, vector<16x3xf32>, vector<16x3xf32> -> vector<64x3xf32>
    %55 = vector.extract_strided_slice %54 {offsets = [0, 0], sizes = [64, 1], strides = [1, 1]} : vector<64x3xf32> to vector<64x1xf32>
    %56 = vector.extract_strided_slice %9 {offsets = [0, 0], sizes = [1, 32], strides = [1, 1]} : vector<3x32xf32> to vector<1x32xf32>
    %57 = vector.broadcast %55 : vector<64x1xf32> to vector<64x32xf32>
    %58 = vector.broadcast %56 : vector<1x32xf32> to vector<64x32xf32>
    %59 = arith.mulf %57, %58 : vector<64x32xf32>
    %60 = vector.extract_strided_slice %54 {offsets = [0, 1], sizes = [64, 1], strides = [1, 1]} : vector<64x3xf32> to vector<64x1xf32>
    %61 = vector.extract_strided_slice %9 {offsets = [1, 0], sizes = [1, 32], strides = [1, 1]} : vector<3x32xf32> to vector<1x32xf32>
    %62 = vector.broadcast %60 : vector<64x1xf32> to vector<64x32xf32>
    %63 = vector.broadcast %61 : vector<1x32xf32> to vector<64x32xf32>
    %64 = arith.mulf %62, %63 : vector<64x32xf32>
    %65 = arith.addf %59, %64 : vector<64x32xf32>
    %66 = vector.extract_strided_slice %54 {offsets = [0, 2], sizes = [64, 1], strides = [1, 1]} : vector<64x3xf32> to vector<64x1xf32>
    %67 = vector.extract_strided_slice %9 {offsets = [2, 0], sizes = [1, 32], strides = [1, 1]} : vector<3x32xf32> to vector<1x32xf32>
    %68 = vector.broadcast %66 : vector<64x1xf32> to vector<64x32xf32>
    %69 = vector.broadcast %67 : vector<1x32xf32> to vector<64x32xf32>
    %70 = arith.mulf %68, %69 : vector<64x32xf32>
    %71 = arith.addf %65, %70 : vector<64x32xf32>
    %72 = vector.broadcast %10 : vector<1x32xf32> to vector<64x32xf32>
    %73 = arith.addf %71, %72 : vector<64x32xf32>
    %cst_26 = arith.constant 0.000000e+00 : f32
    %74 = vector.broadcast %cst_26 : f32 to vector<64x32xf32>
    %75 = arith.maximumf %73, %74 : vector<64x32xf32>
    %c0_27 = arith.constant 0 : index
    %c0_28 = arith.constant 0 : index
    %76 = vector.load %arg9[%c0_27, %c0_28] : memref<32x64xbf16, #tpu.memory_space<vmem>>, vector<32x64xbf16>
    %77 = arith.truncf %75 : vector<64x32xf32> to vector<64x32xbf16>
    %cst_29 = arith.constant dense<0.000000e+00> : vector<64x64xf32>
    %78 = tpu.matmul %77, %76, %cst_29 {dimension_numbers = #tpu.dot_dimension_numbers<[1], [0], [0], [1], [0, 0, 1, 1], [], []>} : vector<64x32xbf16>, vector<32x64xbf16>, vector<64x64xf32> -> vector<64x64xf32>
    %79 = vector.broadcast %11 : vector<1x64xf32> to vector<64x64xf32>
    %80 = arith.addf %78, %79 : vector<64x64xf32>
    %81 = vector.extract_strided_slice %80 {offsets = [0, 0], sizes = [64, 32], strides = [1, 1]} : vector<64x64xf32> to vector<64x32xf32>
    %82 = vector.extract_strided_slice %80 {offsets = [0, 32], sizes = [64, 32], strides = [1, 1]} : vector<64x64xf32> to vector<64x32xf32>
    %83 = arith.subf %12, %48 : vector<64x32xf32>
    %84 = arith.addf %83, %82 : vector<64x32xf32>
    %cst_30 = arith.constant 0.000000e+00 : f32
    %85 = vector.broadcast %cst_30 : f32 to vector<64x32xf32>
    %86 = arith.maximumf %84, %85 : vector<64x32xf32>
    %c0_31 = arith.constant 0 : index
    %c0_32 = arith.constant 0 : index
    %87 = vector.load %arg11[%c0_31, %c0_32] : memref<32x32xbf16, #tpu.memory_space<vmem>>, vector<32x32xbf16>
    %88 = arith.truncf %86 : vector<64x32xf32> to vector<64x32xbf16>
    %cst_33 = arith.constant dense<0.000000e+00> : vector<64x32xf32>
    %89 = tpu.matmul %88, %87, %cst_33 {dimension_numbers = #tpu.dot_dimension_numbers<[1], [0], [0], [1], [0, 0, 1, 1], [], []>} : vector<64x32xbf16>, vector<32x32xbf16>, vector<64x32xf32> -> vector<64x32xf32>
    %c0_34 = arith.constant 0 : index
    %c0_35 = arith.constant 0 : index
    %90 = vector.load %arg12[%c0_34, %c0_35] : memref<1x32xf32, #tpu.memory_space<vmem>>, vector<1x32xf32>
    %91 = vector.broadcast %90 : vector<1x32xf32> to vector<64x32xf32>
    %92 = arith.addf %89, %91 : vector<64x32xf32>
    %cst_36 = arith.constant 0.176776692 : f32
    %93 = vector.broadcast %cst_36 : f32 to vector<64x32xf32>
    %94 = arith.mulf %92, %93 : vector<64x32xf32>
    %95 = arith.addf %49, %81 : vector<64x32xf32>
    %96 = arith.truncf %95 : vector<64x32xf32> to vector<64x32xbf16>
    %97 = vector.shape_cast %96 : vector<64x32xbf16> to vector<4x16x32xbf16>
    %c0_37 = arith.constant 0 : index
    %c0_38 = arith.constant 0 : index
    %c0_39 = arith.constant 0 : index
    %98 = vector.load %arg17[%c0_37, %c0_38, %c0_39] : memref<4x16x32xbf16, #tpu.memory_space<vmem>>, vector<4x16x32xbf16>
    tpu.vector_store %arg17[%c0_37, %c0_38, %c0_39], %97 {strides = array<i32>} : memref<4x16x32xbf16, #tpu.memory_space<vmem>>, vector<4x16x32xbf16>,
    %99 = vector.extract_strided_slice %94 {offsets = [0, 0], sizes = [16, 32], strides = [1, 1]} : vector<64x32xf32> to vector<16x32xf32>
    %c0_40 = arith.constant 0 : index
    %c0_41 = arith.constant 0 : index
    %c0_42 = arith.constant 0 : index
    %100 = vector.load %arg16[%c0_40, %c0_41, %c0_42] : memref<1x16x128xf32, #tpu.memory_space<vmem>>, vector<1x16x32xf32>
    %101 = vector.shape_cast %100 : vector<1x16x32xf32> to vector<16x32xf32>
    %102 = vector.shape_cast %99 : vector<16x32xf32> to vector<1x16x32xf32>
    tpu.vector_store %arg16[%c0_40, %c0_41, %c0_42], %102 {strides = array<i32>} : memref<1x16x128xf32, #tpu.memory_space<vmem>>, vector<1x16x32xf32>,
    %103 = arith.maximumf %13, %99 : vector<16x32xf32>
    %104 = vector.extract_strided_slice %94 {offsets = [16, 0], sizes = [16, 32], strides = [1, 1]} : vector<64x32xf32> to vector<16x32xf32>
    %c0_43 = arith.constant 0 : index
    %c0_44 = arith.constant 0 : index
    %c32 = arith.constant 32 : index
    %105 = vector.load %arg16[%c0_43, %c0_44, %c32] : memref<1x16x128xf32, #tpu.memory_space<vmem>>, vector<1x16x32xf32>
    %106 = vector.shape_cast %105 : vector<1x16x32xf32> to vector<16x32xf32>
    %107 = vector.shape_cast %104 : vector<16x32xf32> to vector<1x16x32xf32>
    tpu.vector_store %arg16[%c0_43, %c0_44, %c32], %107 {strides = array<i32>} : memref<1x16x128xf32, #tpu.memory_space<vmem>>, vector<1x16x32xf32>,
    %108 = arith.maximumf %103, %104 : vector<16x32xf32>
    %109 = vector.extract_strided_slice %94 {offsets = [32, 0], sizes = [16, 32], strides = [1, 1]} : vector<64x32xf32> to vector<16x32xf32>
    %c0_45 = arith.constant 0 : index
    %c0_46 = arith.constant 0 : index
    %c64 = arith.constant 64 : index
    %110 = vector.load %arg16[%c0_45, %c0_46, %c64] : memref<1x16x128xf32, #tpu.memory_space<vmem>>, vector<1x16x32xf32>
    %111 = vector.shape_cast %110 : vector<1x16x32xf32> to vector<16x32xf32>
    %112 = vector.shape_cast %109 : vector<16x32xf32> to vector<1x16x32xf32>
    tpu.vector_store %arg16[%c0_45, %c0_46, %c64], %112 {strides = array<i32>} : memref<1x16x128xf32, #tpu.memory_space<vmem>>, vector<1x16x32xf32>,
    %113 = arith.maximumf %108, %109 : vector<16x32xf32>
    %114 = vector.extract_strided_slice %94 {offsets = [48, 0], sizes = [16, 32], strides = [1, 1]} : vector<64x32xf32> to vector<16x32xf32>
    %c0_47 = arith.constant 0 : index
    %c0_48 = arith.constant 0 : index
    %c96 = arith.constant 96 : index
    %115 = vector.load %arg16[%c0_47, %c0_48, %c96] : memref<1x16x128xf32, #tpu.memory_space<vmem>>, vector<1x16x32xf32>
    %116 = vector.shape_cast %115 : vector<1x16x32xf32> to vector<16x32xf32>
    %117 = vector.shape_cast %114 : vector<16x32xf32> to vector<1x16x32xf32>
    tpu.vector_store %arg16[%c0_47, %c0_48, %c96], %117 {strides = array<i32>} : memref<1x16x128xf32, #tpu.memory_space<vmem>>, vector<1x16x32xf32>,
    %118 = arith.maximumf %113, %114 : vector<16x32xf32>
    %cst_49 = arith.constant 0.000000e+00 : f32
    %119 = vector.broadcast %cst_49 : f32 to vector<16x32xf32>
    %c0_50 = arith.constant 0 : index
    %c0_51 = arith.constant 0 : index
    %c0_52 = arith.constant 0 : index
    %120 = vector.load %arg16[%c0_50, %c0_51, %c0_52] : memref<1x16x128xf32, #tpu.memory_space<vmem>>, vector<1x16x32xf32>
    %121 = vector.shape_cast %120 : vector<1x16x32xf32> to vector<16x32xf32>
    %122 = arith.subf %121, %118 : vector<16x32xf32>
    %123 = math.exp %122 : vector<16x32xf32>
    %c0_53 = arith.constant 0 : index
    %c0_54 = arith.constant 0 : index
    %c0_55 = arith.constant 0 : index
    %124 = vector.load %arg16[%c0_53, %c0_54, %c0_55] : memref<1x16x128xf32, #tpu.memory_space<vmem>>, vector<1x16x32xf32>
    %125 = vector.shape_cast %124 : vector<1x16x32xf32> to vector<16x32xf32>
    %126 = vector.shape_cast %123 : vector<16x32xf32> to vector<1x16x32xf32>
    tpu.vector_store %arg16[%c0_53, %c0_54, %c0_55], %126 {strides = array<i32>} : memref<1x16x128xf32, #tpu.memory_space<vmem>>, vector<1x16x32xf32>,
    %127 = arith.addf %119, %123 : vector<16x32xf32>
    %c0_56 = arith.constant 0 : index
    %c0_57 = arith.constant 0 : index
    %c32_58 = arith.constant 32 : index
    %128 = vector.load %arg16[%c0_56, %c0_57, %c32_58] : memref<1x16x128xf32, #tpu.memory_space<vmem>>, vector<1x16x32xf32>
    %129 = vector.shape_cast %128 : vector<1x16x32xf32> to vector<16x32xf32>
    %130 = arith.subf %129, %118 : vector<16x32xf32>
    %131 = math.exp %130 : vector<16x32xf32>
    %c0_59 = arith.constant 0 : index
    %c0_60 = arith.constant 0 : index
    %c32_61 = arith.constant 32 : index
    %132 = vector.load %arg16[%c0_59, %c0_60, %c32_61] : memref<1x16x128xf32, #tpu.memory_space<vmem>>, vector<1x16x32xf32>
    %133 = vector.shape_cast %132 : vector<1x16x32xf32> to vector<16x32xf32>
    %134 = vector.shape_cast %131 : vector<16x32xf32> to vector<1x16x32xf32>
    tpu.vector_store %arg16[%c0_59, %c0_60, %c32_61], %134 {strides = array<i32>} : memref<1x16x128xf32, #tpu.memory_space<vmem>>, vector<1x16x32xf32>,
    %135 = arith.addf %127, %131 : vector<16x32xf32>
    %c0_62 = arith.constant 0 : index
    %c0_63 = arith.constant 0 : index
    %c64_64 = arith.constant 64 : index
    %136 = vector.load %arg16[%c0_62, %c0_63, %c64_64] : memref<1x16x128xf32, #tpu.memory_space<vmem>>, vector<1x16x32xf32>
    %137 = vector.shape_cast %136 : vector<1x16x32xf32> to vector<16x32xf32>
    %138 = arith.subf %137, %118 : vector<16x32xf32>
    %139 = math.exp %138 : vector<16x32xf32>
    %c0_65 = arith.constant 0 : index
    %c0_66 = arith.constant 0 : index
    %c64_67 = arith.constant 64 : index
    %140 = vector.load %arg16[%c0_65, %c0_66, %c64_67] : memref<1x16x128xf32, #tpu.memory_space<vmem>>, vector<1x16x32xf32>
    %141 = vector.shape_cast %140 : vector<1x16x32xf32> to vector<16x32xf32>
    %142 = vector.shape_cast %139 : vector<16x32xf32> to vector<1x16x32xf32>
    tpu.vector_store %arg16[%c0_65, %c0_66, %c64_67], %142 {strides = array<i32>} : memref<1x16x128xf32, #tpu.memory_space<vmem>>, vector<1x16x32xf32>,
    %143 = arith.addf %135, %139 : vector<16x32xf32>
    %c0_68 = arith.constant 0 : index
    %c0_69 = arith.constant 0 : index
    %c96_70 = arith.constant 96 : index
    %144 = vector.load %arg16[%c0_68, %c0_69, %c96_70] : memref<1x16x128xf32, #tpu.memory_space<vmem>>, vector<1x16x32xf32>
    %145 = vector.shape_cast %144 : vector<1x16x32xf32> to vector<16x32xf32>
    %146 = arith.subf %145, %118 : vector<16x32xf32>
    %147 = math.exp %146 : vector<16x32xf32>
    %c0_71 = arith.constant 0 : index
    %c0_72 = arith.constant 0 : index
    %c96_73 = arith.constant 96 : index
    %148 = vector.load %arg16[%c0_71, %c0_72, %c96_73] : memref<1x16x128xf32, #tpu.memory_space<vmem>>, vector<1x16x32xf32>
    %149 = vector.shape_cast %148 : vector<1x16x32xf32> to vector<16x32xf32>
    %150 = vector.shape_cast %147 : vector<16x32xf32> to vector<1x16x32xf32>
    tpu.vector_store %arg16[%c0_71, %c0_72, %c96_73], %150 {strides = array<i32>} : memref<1x16x128xf32, #tpu.memory_space<vmem>>, vector<1x16x32xf32>,
    %151 = arith.addf %143, %147 : vector<16x32xf32>
    %152 = tpu.reciprocal %151 {approx = true} : vector<16x32xf32> -> vector<16x32xf32>
    %cst_74 = arith.constant 0.000000e+00 : f32
    %153 = vector.broadcast %cst_74 : f32 to vector<16x32xf32>
    %c0_75 = arith.constant 0 : index
    %c0_76 = arith.constant 0 : index
    %c0_77 = arith.constant 0 : index
    %154 = vector.load %arg16[%c0_75, %c0_76, %c0_77] : memref<1x16x128xf32, #tpu.memory_space<vmem>>, vector<1x16x32xf32>
    %155 = vector.shape_cast %154 : vector<1x16x32xf32> to vector<16x32xf32>
    %156 = arith.mulf %155, %152 : vector<16x32xf32>
    %c0_78 = arith.constant 0 : index
    %c0_79 = arith.constant 0 : index
    %c0_80 = arith.constant 0 : index
    %157 = vector.load %arg16[%c0_78, %c0_79, %c0_80] : memref<1x16x128xf32, #tpu.memory_space<vmem>>, vector<1x16x32xf32>
    %158 = vector.shape_cast %157 : vector<1x16x32xf32> to vector<16x32xf32>
    %159 = vector.shape_cast %156 : vector<16x32xf32> to vector<1x16x32xf32>
    tpu.vector_store %arg16[%c0_78, %c0_79, %c0_80], %159 {strides = array<i32>} : memref<1x16x128xf32, #tpu.memory_space<vmem>>, vector<1x16x32xf32>,
    %c0_81 = arith.constant 0 : index
    %c0_82 = arith.constant 0 : index
    %c0_83 = arith.constant 0 : index
    %160 = vector.load %arg17[%c0_81, %c0_82, %c0_83] : memref<4x16x32xbf16, #tpu.memory_space<vmem>>, vector<1x16x32xbf16>
    %161 = vector.shape_cast %160 : vector<1x16x32xbf16> to vector<16x32xbf16>
    %162 = arith.extf %161 : vector<16x32xbf16> to vector<16x32xf32>
    %163 = arith.mulf %156, %162 : vector<16x32xf32>
    %164 = arith.addf %153, %163 : vector<16x32xf32>
    %c0_84 = arith.constant 0 : index
    %c0_85 = arith.constant 0 : index
    %c32_86 = arith.constant 32 : index
    %165 = vector.load %arg16[%c0_84, %c0_85, %c32_86] : memref<1x16x128xf32, #tpu.memory_space<vmem>>, vector<1x16x32xf32>
    %166 = vector.shape_cast %165 : vector<1x16x32xf32> to vector<16x32xf32>
    %167 = arith.mulf %166, %152 : vector<16x32xf32>
    %c0_87 = arith.constant 0 : index
    %c0_88 = arith.constant 0 : index
    %c32_89 = arith.constant 32 : index
    %168 = vector.load %arg16[%c0_87, %c0_88, %c32_89] : memref<1x16x128xf32, #tpu.memory_space<vmem>>, vector<1x16x32xf32>
    %169 = vector.shape_cast %168 : vector<1x16x32xf32> to vector<16x32xf32>
    %170 = vector.shape_cast %167 : vector<16x32xf32> to vector<1x16x32xf32>
    tpu.vector_store %arg16[%c0_87, %c0_88, %c32_89], %170 {strides = array<i32>} : memref<1x16x128xf32, #tpu.memory_space<vmem>>, vector<1x16x32xf32>,
    %c1 = arith.constant 1 : index
    %c0_90 = arith.constant 0 : index
    %c0_91 = arith.constant 0 : index
    %171 = vector.load %arg17[%c1, %c0_90, %c0_91] : memref<4x16x32xbf16, #tpu.memory_space<vmem>>, vector<1x16x32xbf16>
    %172 = vector.shape_cast %171 : vector<1x16x32xbf16> to vector<16x32xbf16>
    %173 = arith.extf %172 : vector<16x32xbf16> to vector<16x32xf32>
    %174 = arith.mulf %167, %173 : vector<16x32xf32>
    %175 = arith.addf %164, %174 : vector<16x32xf32>
    %c0_92 = arith.constant 0 : index
    %c0_93 = arith.constant 0 : index
    %c64_94 = arith.constant 64 : index
    %176 = vector.load %arg16[%c0_92, %c0_93, %c64_94] : memref<1x16x128xf32, #tpu.memory_space<vmem>>, vector<1x16x32xf32>
    %177 = vector.shape_cast %176 : vector<1x16x32xf32> to vector<16x32xf32>
    %178 = arith.mulf %177, %152 : vector<16x32xf32>
    %c0_95 = arith.constant 0 : index
    %c0_96 = arith.constant 0 : index
    %c64_97 = arith.constant 64 : index
    %179 = vector.load %arg16[%c0_95, %c0_96, %c64_97] : memref<1x16x128xf32, #tpu.memory_space<vmem>>, vector<1x16x32xf32>
    %180 = vector.shape_cast %179 : vector<1x16x32xf32> to vector<16x32xf32>
    %181 = vector.shape_cast %178 : vector<16x32xf32> to vector<1x16x32xf32>
    tpu.vector_store %arg16[%c0_95, %c0_96, %c64_97], %181 {strides = array<i32>} : memref<1x16x128xf32, #tpu.memory_space<vmem>>, vector<1x16x32xf32>,
    %c2 = arith.constant 2 : index
    %c0_98 = arith.constant 0 : index
    %c0_99 = arith.constant 0 : index
    %182 = vector.load %arg17[%c2, %c0_98, %c0_99] : memref<4x16x32xbf16, #tpu.memory_space<vmem>>, vector<1x16x32xbf16>
    %183 = vector.shape_cast %182 : vector<1x16x32xbf16> to vector<16x32xbf16>
    %184 = arith.extf %183 : vector<16x32xbf16> to vector<16x32xf32>
    %185 = arith.mulf %178, %184 : vector<16x32xf32>
    %186 = arith.addf %175, %185 : vector<16x32xf32>
    %c0_100 = arith.constant 0 : index
    %c0_101 = arith.constant 0 : index
    %c96_102 = arith.constant 96 : index
    %187 = vector.load %arg16[%c0_100, %c0_101, %c96_102] : memref<1x16x128xf32, #tpu.memory_space<vmem>>, vector<1x16x32xf32>
    %188 = vector.shape_cast %187 : vector<1x16x32xf32> to vector<16x32xf32>
    %189 = arith.mulf %188, %152 : vector<16x32xf32>
    %c0_103 = arith.constant 0 : index
    %c0_104 = arith.constant 0 : index
    %c96_105 = arith.constant 96 : index
    %190 = vector.load %arg16[%c0_103, %c0_104, %c96_105] : memref<1x16x128xf32, #tpu.memory_space<vmem>>, vector<1x16x32xf32>
    %191 = vector.shape_cast %190 : vector<1x16x32xf32> to vector<16x32xf32>
    %192 = vector.shape_cast %189 : vector<16x32xf32> to vector<1x16x32xf32>
    tpu.vector_store %arg16[%c0_103, %c0_104, %c96_105], %192 {strides = array<i32>} : memref<1x16x128xf32, #tpu.memory_space<vmem>>, vector<1x16x32xf32>,
    %c3 = arith.constant 3 : index
    %c0_106 = arith.constant 0 : index
    %c0_107 = arith.constant 0 : index
    %193 = vector.load %arg17[%c3, %c0_106, %c0_107] : memref<4x16x32xbf16, #tpu.memory_space<vmem>>, vector<1x16x32xbf16>
    %194 = vector.shape_cast %193 : vector<1x16x32xbf16> to vector<16x32xbf16>
    %195 = arith.extf %194 : vector<16x32xbf16> to vector<16x32xf32>
    %196 = arith.mulf %189, %195 : vector<16x32xf32>
    %197 = arith.addf %186, %196 : vector<16x32xf32>
    %c0_108 = arith.constant 0 : index
    %c0_109 = arith.constant 0 : index
    %198 = vector.load %arg13[%c0_108, %c0_109] : memref<32x8xbf16, #tpu.memory_space<vmem>>, vector<32x8xbf16>
    %199 = arith.truncf %197 : vector<16x32xf32> to vector<16x32xbf16>
    %cst_110 = arith.constant dense<0.000000e+00> : vector<16x8xf32>
    %200 = tpu.matmul %199, %198, %cst_110 {dimension_numbers = #tpu.dot_dimension_numbers<[1], [0], [0], [1], [0, 0, 1, 1], [], []>} : vector<16x32xbf16>, vector<32x8xbf16>, vector<16x8xf32> -> vector<16x8xf32>
    %c0_111 = arith.constant 0 : index
    %c0_112 = arith.constant 0 : index
    %201 = vector.load %arg14[%c0_111, %c0_112] : memref<1x8xf32, #tpu.memory_space<vmem>>, vector<1x8xf32>
    %202 = vector.broadcast %201 : vector<1x8xf32> to vector<16x8xf32>
    %203 = arith.addf %200, %202 : vector<16x8xf32>
    %c0_113 = arith.constant 0 : index
    %c0_114 = arith.constant 0 : index
    %c0_115 = arith.constant 0 : index
    %204 = vector.load %arg2[%c0_113, %c0_114, %c0_115] : memref<1x16x8xf32, #tpu.memory_space<vmem>>, vector<1x16x8xf32>
    %205 = vector.shape_cast %204 : vector<1x16x8xf32> to vector<16x8xf32>
    %206 = arith.addf %203, %205 : vector<16x8xf32>
    %c0_116 = arith.constant 0 : index
    %c0_117 = arith.constant 0 : index
    %c0_118 = arith.constant 0 : index
    %207 = vector.load %arg15[%c0_116, %c0_117, %c0_118] : memref<1x16x8xf32, #tpu.memory_space<vmem>>, vector<1x16x8xf32>
    %208 = vector.shape_cast %207 : vector<1x16x8xf32> to vector<16x8xf32>
    %209 = vector.shape_cast %206 : vector<16x8xf32> to vector<1x16x8xf32>
    tpu.vector_store %arg15[%c0_116, %c0_117, %c0_118], %209 {strides = array<i32>} : memref<1x16x8xf32, #tpu.memory_space<vmem>>, vector<1x16x8xf32>,
    return
  }
  func.func @transform_0(%arg0: i32, %arg1: i32) -> (i32, i32, i32) {
    %c0_i32 = arith.constant 0 : i32
    %c0_i32_0 = arith.constant 0 : i32
    return %arg0, %arg1, %c0_i32 : i32, i32, i32
  }
  func.func @transform_1(%arg0: i32, %arg1: i32) -> (i32, i32, i32) {
    %c0_i32 = arith.constant 0 : i32
    %c0_i32_0 = arith.constant 0 : i32
    return %arg0, %arg1, %c0_i32 : i32, i32, i32
  }
  func.func @transform_2(%arg0: i32, %arg1: i32) -> (i32, i32, i32) {
    %c0_i32 = arith.constant 0 : i32
    %c0_i32_0 = arith.constant 0 : i32
    return %arg0, %arg1, %c0_i32 : i32, i32, i32
  }
  func.func @transform_3(%arg0: i32, %arg1: i32) -> (i32, i32, i32) {
    %c0_i32 = arith.constant 0 : i32
    %c0_i32_0 = arith.constant 0 : i32
    return %arg0, %arg1, %c0_i32 : i32, i32, i32
  }
  func.func @transform_4(%arg0: i32, %arg1: i32) -> (i32, i32, i32) {
    %c0_i32 = arith.constant 0 : i32
    %c0_i32_0 = arith.constant 0 : i32
    %c0_i32_1 = arith.constant 0 : i32
    return %arg0, %c0_i32, %c0_i32_0 : i32, i32, i32
  }
  func.func @transform_5(%arg0: i32, %arg1: i32) -> (i32, i32) {
    %c0_i32 = arith.constant 0 : i32
    %c0_i32_0 = arith.constant 0 : i32
    %c0_i32_1 = arith.constant 0 : i32
    return %c0_i32, %c0_i32_0 : i32, i32
  }
  func.func @transform_6(%arg0: i32, %arg1: i32) -> (i32, i32) {
    %c0_i32 = arith.constant 0 : i32
    %c0_i32_0 = arith.constant 0 : i32
    %c0_i32_1 = arith.constant 0 : i32
    return %c0_i32, %c0_i32_0 : i32, i32
  }
  func.func @transform_7(%arg0: i32, %arg1: i32) -> (i32, i32) {
    %c0_i32 = arith.constant 0 : i32
    %c0_i32_0 = arith.constant 0 : i32
    %c0_i32_1 = arith.constant 0 : i32
    return %c0_i32, %c0_i32_0 : i32, i32
  }
  func.func @transform_8(%arg0: i32, %arg1: i32) -> (i32, i32) {
    %c0_i32 = arith.constant 0 : i32
    %c0_i32_0 = arith.constant 0 : i32
    %c0_i32_1 = arith.constant 0 : i32
    return %c0_i32, %c0_i32_0 : i32, i32
  }
  func.func @transform_9(%arg0: i32, %arg1: i32) -> (i32, i32) {
    %c0_i32 = arith.constant 0 : i32
    %c0_i32_0 = arith.constant 0 : i32
    %c0_i32_1 = arith.constant 0 : i32
    return %c0_i32, %c0_i32_0 : i32, i32
  }
  func.func @transform_10(%arg0: i32, %arg1: i32) -> (i32, i32) {
    %c0_i32 = arith.constant 0 : i32
    %c0_i32_0 = arith.constant 0 : i32
    %c0_i32_1 = arith.constant 0 : i32
    return %c0_i32, %c0_i32_0 : i32, i32
  }
  func.func @transform_11(%arg0: i32, %arg1: i32) -> (i32, i32) {
    %c0_i32 = arith.constant 0 : i32
    %c0_i32_0 = arith.constant 0 : i32
    %c0_i32_1 = arith.constant 0 : i32
    return %c0_i32, %c0_i32_0 : i32, i32
  }
  func.func @transform_12(%arg0: i32, %arg1: i32) -> (i32, i32) {
    %c0_i32 = arith.constant 0 : i32
    %c0_i32_0 = arith.constant 0 : i32
    %c0_i32_1 = arith.constant 0 : i32
    return %c0_i32, %c0_i32_0 : i32, i32
  }
  func.func @transform_13(%arg0: i32, %arg1: i32) -> (i32, i32, i32) {
    %c0_i32 = arith.constant 0 : i32
    %c0_i32_0 = arith.constant 0 : i32
    return %arg0, %arg1, %c0_i32 : i32, i32, i32
  }
  func.func @transform_14(%arg0: i32, %arg1: i32) -> (i32, i32, i32) {
    %c0_i32 = arith.constant 0 : i32
    %c0_i32_0 = arith.constant 0 : i32
    return %arg0, %arg1, %c0_i32 : i32, i32, i32
  }
}

</mosaic_0001>

<bundles_post_ra>
// kernel: tpu_custom_call.1
= control target key start
LH: loop header
LB: loop body
LE: loop exit
PB: predicated region body
PF: predicated region fallthrough
CT: control target
= control target key end

     0   :  { %s2646_s0 = inlined_call_operand.vmem [shape: f32[2,16,8], index: 0, kind: input, shape index: {}]   ;;  %s2647_s1 = inlined_call_operand.vmem [shape: f32[2,16,32], index: 1, kind: input, shape index: {}]   ;;  %s2648_s2 = inlined_call_operand.vmem [shape: s32[2,16,4], index: 2, kind: input, shape index: {}]   ;;  %s2649_s3 = inlined_call_operand.vmem [shape: f32[2,16,12], index: 3, kind: input, shape index: {}]   ;;  %s2650_s4 = inlined_call_operand.vmem [shape: bf16[2,16,64], index: 4, kind: input, shape index: {}]   ;;  %s2651_s5 = inlined_call_operand.vmem [shape: f32[3,32], index: 5, kind: input, shape index: {}]   ;;  %s2652_s6 = inlined_call_operand.vmem [shape: f32[1,32], index: 6, kind: input, shape index: {}]   ;;  %s2653_s7 = inlined_call_operand.vmem [shape: bf16[32,64], index: 7, kind: input, shape index: {}]   ;;  %s2654_s8 = inlined_call_operand.vmem [shape: f32[1,64], index: 8, kind: input, shape index: {}]   ;;  %s2655_s9 = inlined_call_operand.vmem [shape: bf16[32,32], index: 9, kind: input, shape index: {}]   ;;  %s2656_s10 = inlined_call_operand.vmem [shape: f32[1,32], index: 10, kind: input, shape index: {}]   ;;  %s2657_s11 = inlined_call_operand.vmem [shape: bf16[32,8], index: 11, kind: input, shape index: {}]   ;;  %s2658_s12 = inlined_call_operand.vmem [shape: f32[1,8], index: 12, kind: input, shape index: {}]   ;;  %s2659_s13 = inlined_call_operand.vmem [shape: f32[2,16,8], index: 13, kind: output, shape index: {0}]   ;;  %s2660_s14 = inlined_call_operand.hbm [shape: f32[2,16,128], index: 14, kind: output, shape index: {1}]  }
   0x1   :  { %2663 = sst [smem:[#allocation8_spill]] %s2647_s1 }
   0x2   :  { %2664 = sst [smem:[#allocation9_spill]] %s2648_s2 }
   0x3   :  { %2665 = sst [smem:[#allocation10_spill]] %s2649_s3 }
   0x4   :  { %2666 = sst [smem:[#allocation11_spill]] %s2650_s4 }
   0x5   :  { %2667 = sst [smem:[#allocation12_spill]] %s2651_s5 }
   0x6   :  { %2668 = sst [smem:[#allocation13_spill]] %s2652_s6 }
   0x7   :  { %2669 = sst [smem:[#allocation14_spill]] %s2653_s7 }
   0x8   :  { %20 = vsyncpa [#allocation4], 0 }
   0x9   :  { %22 = vsyncpa [#allocation4 + $0x1], 0  ;;  %s2141_s29 = smov 0   ;;  %s2143_s30 = smov 0  }
   0xa   :  { %s2145_s15 = smov 0   ;;  %s2147_s16 = smov 0  }
   0xb   :  { %s2149_s17 = smov 0   ;;  %s2151_s18 = smov 0  }
   0xc LB: > { %2670 = sst [smem:[#allocation6_spill]] %s2047_s17  ;;  %s1746_s19 = sadd.s32 4294967295, %s2051_s18   ;;  %s2051_s18 = sphi %s2151_s18, %s28_s18   ;;  %s2047_s17 = sphi %s2149_s17, %s2682_s17   ;;  %s2043_s16 = sphi %s2147_s16, %s2681_s16   ;;  %s2039_s15 = sphi %s2145_s15, %s2685_s15   ;;  %s2035_s30 = sphi %s2143_s30, %s2684_s30   ;;  %s2031_s29 = sphi %s2141_s29, %s2683_s29  }
   0xd   : > { %s1747_s20 = sadd.s32 4294967294, %s2051_s18   ;;  %s40_s21 = sadd.s32 1, %s2047_s17 }
   0xe   : > { %s383_s22 = sadd.s32 1, %s2039_s15  ;;  %p42_p0 = scmp.ge.s32.totalorder %s40_s21, 2 }
   0xf   : > { %p393_p1 = scmp.ne.s32.totalorder %s2039_s15, %s2035_s30  ;;  %p394_p2 = scmp.eq.s32.totalorder %s1746_s19, 1 }
  0x10   : > { %p399_p3 = scmp.ne.s32.totalorder %s2035_s30, %s2031_s29  ;;  %s2687_s21 = smov (%p42_p0, %s40_s21), 0 }
  0x11   : > { %2671 = sst [smem:[#allocation7_spill]] %s2687_s21  ;;  %p2181_p4 = por %p394_p2, %p393_p1 }
  0x12   : > { %p400_p5 = scmp.eq.s32.totalorder %s1747_s20, 1  ;;  %s378_s24 = ssub.s32 %s2047_s17, %s2687_s21 }
  0x13   : > { %p1750_p6 = scmp.ge.s32.totalorder %s2051_s18, 1  ;;  %p381_p7 = scmp.eq.s32.totalorder %s378_s24, 0 }
  0x14   : > { %p2188_p8 = por %p400_p5, %p399_p3  ;;  %p502_p9 = scmp.lt.s32.totalorder %s2051_s18, 3 }
  0x15   : > { %s2194_s26 = scalar_select %p381_p7, %s2039_s15, %s383_s22  }
  0x16   : > { %p503_p10 = pnand %p1750_p6, %p502_p9 }
  0x17   : > { %p594_p11 = scmp.lt.s32.totalorder (!%p503_p10), %s2043_s16, 1  ;;  %s2674_s3 = sld [smem:[#allocation10_spill]] (!%p503_p10) }
  0x18   : > { %506 = sbr.rel (%p503_p10) target bundleno = 1461 (0x5b5), region = 72  ;;  %s2055_s24 = smov (!%p503_p10), 122  }
  0x19   : > { %s2056_s21 = smov (!%p503_p10), 125   ;;  %s2058_s19 = smov (!%p503_p10), 119  }
  0x1a   : > { %s2675_s2 = sld [smem:[#allocation9_spill]] (!%p503_p10)  ;;  %s590_s17 = sand.u32 (!%p503_p10), 1, %s2035_s30  }
  0x1b   : > { %s2676_s7 = sld [smem:[#allocation14_spill]] (!%p503_p10) }
  0x1c   : > { %s2677_s5 = sld [smem:[#allocation12_spill]] (!%p503_p10) }
  0x1d   : > { %v2053_v0 = vmov 1   ;;  %s2200_s27 = scalar_select %p594_p11, %s2043_s16, 1  ;;  %v2054_v1 = vmov 0   ;;  %v2057_v4 = vmov 2   ;;  %vm974_vm0 = vcmask 261120  }
  0x1e   : > { %1910 = vset.pattern.permute.xlu1 %v2053_v0  ;;  %1909 = vset.pattern.permute.xlu0 %v2053_v0  ;;  %s2678_s6 = sld [smem:[#allocation13_spill]]  ;;  %v658_v56 = vlaneseq  ;;  %vm737_vm3 = vcmask 130048   ;;  %vm1236_vm10 = vcmask 523520   ;;  %vm1249_vm11 = vcmask 785920  }
  0x1f   : > { %1908 = vset.pattern.permute.xlu2 %v2054_v1  ;;  %s2204_s28 = sshll.u32 %s2200_s27, 4  ;;  %s2679_s4 = sld [smem:[#allocation11_spill]]  ;;  %vm1262_vm12 = vcmask 1048320   ;;  %vm1217_vm13 = vcmask 257024  }
  0x20   : > { %s631_s22 = scalar_lea.vmem %s2674_s3, %s2204_s28  ;;  %v2289_v61 = vand.u32 127, %v658_v56  ;;  %s2061_s3 = smov 96  }
  0x21   : > { %v652_v2 = vld [vmem:[%s631_s22] sm:$0xff]  ;;  %v653_v3 = vld [vmem:[%s631_s22 + $0x8] sm:$0xff]  ;;  %s2680_s1 = sld [smem:[#allocation8_spill]] }
  0x22   : > { %785 = vrot.lane.b32.xlu1 %v652_v2, %s2055_s24  ;;  %781 = vrot.lane.b32.xlu0 %v652_v2, %s2056_s21  ;;  %v1818_v6 = vld [vmem:[%s2676_s7 + $0x8] sm:$0xff]  ;;  %v1817_v10 = vld [vmem:[%s2676_s7] sm:$0xff] }
  0x23   : > { %794 = vperm.xlu2 %1908, %v652_v2   ;;  %993 = vmatpush.bf16.msra.mxu1 %v1818_v6  ;;  %v660_v14 = vld [vmem:[%s2677_s5] sm:$0x7] }
  0x24   : > { %v2235_v15 = vperm.slane %v660_v14, 0  ;;  %v2237_v16 = vperm.slane %v660_v14, 1  ;;  %v2240_v20 = vperm.slane %v660_v14, 2  ;;  %v2251_v27 = vld [vmem:[%s2678_s6] ss:$0 sm:$0xff] }
  0x27   : > { %994 = vmatpush.bf16.msra.mxu1 %v1817_v10  ;;  %s611_s22 = scalar_lea.vmem %s2680_s1, %s2204_s28  ;;  %s1543_s1 = scalar_lea.sflag [#allocation4], %s590_s17 }
  0x2a   : > { %787 = vrot.lane.b32.xlu1 %v653_v3, %s2055_s24  ;;  %783 = vrot.lane.b32.xlu0 %v653_v3, %s2056_s21  ;;  %s2218_s21 = scalar_lea.vmem %s2675_s2, %s2204_s28 }
  0x2b   : > { %798 = vperm.xlu2 %1908, %v653_v3   ;;  %v2221_v5 = vld [vmem:[%s2218_s21] sm:$0xff]  ;;  %v2254_v29 = vld [vmem:[%s2218_s21 + $0x8] sm:$0xff]  ;;  %s1814_s21 = sshll.u32 %s2200_s27, 3  ;;  %s2062_s27 = smov 32  }
  0x2c   : > { %s637_s20 = scalar_lea.vmem %s2679_s4, %s1814_s21 }
  0x2d   : > { %v1816_v43 = vld [vmem:[%s637_s20] sm:$0xff] }
  0x2e   : > { %757 = vmatpush.bf16.msra.mxu0 %v1816_v43 }
  0x32   : > { %839 = vperm.xlu1 %1910, %v653_v3   ;;  %835 = vperm.xlu0 %1909, %v652_v2  }
  0x33   : > { %1911 = vset.pattern.permute.xlu2 %v2057_v4 }
  0x34   : > { %884 = vperm.xlu2 %1911, %v652_v2  }
  0x3a   : > { %1912 = vset.pattern.permute.xlu1 %v2057_v4  ;;  %791 = vrot.lane.b32.xlu0 %v653_v3, %s2058_s19 }
  0x3b   : > { %888 = vperm.xlu1 %1912, %v653_v3  }
  0x3c   : > { %789 = vrot.lane.b32.xlu2 %v652_v2, %s2058_s19  ;;  %s1751_s19 = sshll.u32 %s590_s17, 4 }
  0x3d   : > { %1913 = vset.pattern.permute.xlu2 %v2054_v1  ;;  %s2427_s20 = scalar_lea.vmem [#allocation3], %s1751_s19 }
  0x3e   : > { %s1561_s24 = sshll.u32 %s2427_s20, 4  ;;  %s1562_s24 = int_to_ptr.vmem [resolvable:$true] %s1561_s24 }
  0x43   : > { %1914 = vset.pattern.permute.xlu1 %v2054_v1 }
  0x44   : > { %664 = vperm.xlu2 %1913, %v2221_v5  }
  0x7d   : > { %v795_v7 = vpop.permute.xlu2 %794 }
  0x7e   : > { %v826_v17 = vmul.f32 %v2235_v15, %v795_v7  ;;  %v2060_v7 = vmov 0.0  }
  0x85   : > { %v799_v11 = vpop.permute.xlu2 %798 }
  0x86   : > { %v827_v25 = vmul.f32 %v2235_v15, %v799_v11 }
  0x8e   : > { %v885_v22 = vpop.permute.xlu2 %884 }
  0x8f   : > { %v916_v24 = vmul.f32 %v2240_v20, %v885_v22 }
  0x94   : > { %v782_v8 = vpop.permute.xlu0 %781  ;;  %v786_v9 = vpop.permute.xlu1 %785 }
  0x95   : > { %843 = vperm.xlu0 %1909, %v782_v8   ;;  %802 = vperm.xlu1 %1914, %v782_v8  }
  0x96   : > { %v790_v39 = vpop.permute.xlu2 %789 }
  0x9c   : > { %v784_v12 = vpop.permute.xlu0 %783  ;;  %v788_v13 = vpop.permute.xlu1 %787 }
  0x9d   : > { %1917 = vset.pattern.permute.xlu0 %v2057_v4  ;;  %1915 = vset.pattern.permute.xlu1 %v2053_v0 }
  0x9e   : > { %806 = vperm.xlu2 %1913, %v784_v12   ;;  %896 = vperm.xlu0 %1917, %v784_v12   ;;  %v665_v41 = vpop.permute.xlu2 %664 }
  0x9f   : > { %847 = vperm.xlu1 %1915, %v784_v12   ;;  %vm669_vm1 = vcmp.eq.s32.totalorder %v665_v41, %v2289_v61 }
  0xa4   : > { %v840_v18 = vpop.permute.xlu1 %839  ;;  %v836_v19 = vpop.permute.xlu0 %835 }
  0xa5   : > { %v867_v21 = vmul.f32 %v2237_v16, %v836_v19  ;;  %v868_v26 = vmul.f32 %v2237_v16, %v840_v18 }
  0xa6   : > { %1916 = vset.pattern.permute.xlu2 %v2057_v4  ;;  %900 = vperm.xlu0 %1917, %v786_v9  }
  0xa7   : > { %1918 = vset.pattern.permute.xlu1 %v2054_v1  ;;  %892 = vperm.xlu2 %1916, %v782_v8   ;;  %v875_v23 = vadd.f32 %v867_v21, %v826_v17  ;;  %v876_v31 = vadd.f32 %v868_v26, %v827_v25  ;;  %v671_v8 = vsel %vm669_vm1, 1.0, %v2060_v7 }
  0xa8   : > { %810 = vperm.xlu1 %1918, %v786_v9   ;;  %v673_v10 = vpack.c.bf16 %v671_v8, %v671_v8 }
  0xa9   : > { %v924_v28 = vadd.f32 %v916_v24, %v875_v23 }
  0xaa   : > { %v713_v17 = vunpack.c.l.b16 %v673_v10 }
  0xab   : > { %v935_v33 = vadd.f32 %v2251_v27, %v924_v28 }
  0xac   : > { %v792_v40 = vpop.permute.xlu0 %791 }
  0xad   : > { %v889_v30 = vpop.permute.xlu1 %888  ;;  %v943_v36 = vmax.f32 %v935_v33, 0.0 }
  0xae   : > { %v917_v32 = vmul.f32 %v2240_v20, %v889_v30  ;;  %1922 = vset.pattern.permute.xlu0 %v2054_v1 }
  0xaf   : > { %667 = vperm.xlu0 %1922, %v2254_v29   ;;  %1919 = vset.pattern.permute.xlu2 %v2054_v1 }
  0xb0   : > { %v925_v34 = vadd.f32 %v917_v32, %v876_v31  ;;  %1920 = vset.pattern.permute.xlu1 %v2053_v0  ;;  %814 = vperm.xlu2 %1919, %v788_v13  }
  0xb1   : > { %851 = vperm.xlu1 %1920, %v786_v9  }
  0xb2   : > { %v936_v35 = vadd.f32 %v2251_v27, %v925_v34  ;;  %v2311_v34 = vld [vmem:[%s2654_s8] ss:$0 sm:$0xff] }
  0xb4   : > { %v944_v37 = vmax.f32 %v936_v35, 0.0 }
  0xb6   : > { %v955_v38 = vpack.c.bf16 %v944_v37, %v943_v36 }
  0xb7   : > { %1928 = vset.pattern.permute.xlu0 %v2057_v4 }
  0xb8   : > { %1780 = vmatmul.msk.bf16.vlgmr.msra.gmra.mxu1 %vm974_vm0, %v955_v38  ;;  %1921 = vset.pattern.permute.xlu2 %v2053_v0 }
  0xb9   : > { %1923 = vset.pattern.permute.xlu1 %v2057_v4  ;;  %855 = vperm.xlu2 %1921, %v788_v13  }
  0xba   : > { %904 = vperm.xlu1 %1923, %v788_v13   ;;  %908 = vperm.xlu0 %1928, %v790_v39  }
  0xc1   : > { %1925 = vset.pattern.permute.xlu2 %v2054_v1 }
  0xc2   : > { %1924 = vset.pattern.permute.xlu1 %v2054_v1  ;;  %822 = vperm.xlu2 %1925, %v792_v40  }
  0xc3   : > { %818 = vperm.xlu1 %1924, %v790_v39   ;;  %691 = vperm.xlu0 %1928, %v2254_v29  }
  0xca   : > { %1927 = vset.pattern.permute.xlu2 %v2053_v0 }
  0xcb   : > { %1926 = vset.pattern.permute.xlu1 %v2053_v0  ;;  %863 = vperm.xlu2 %1927, %v792_v40  }
  0xcc   : > { %859 = vperm.xlu1 %1926, %v790_v39  }
  0xd3   : > { %676 = vperm.xlu2 %1927, %v2221_v5  }
  0xd4   : > { %1929 = vset.pattern.permute.xlu1 %v2057_v4 }
  0xd5   : > { %912 = vperm.xlu1 %1929, %v792_v40  }
  0xdb   : > { %1931 = vset.pattern.permute.xlu2 %v2057_v4 }
  0xdc   : > { %688 = vperm.xlu2 %1931, %v2221_v5  }
  0xdd   : > { %1930 = vset.pattern.permute.xlu1 %v2053_v0  ;;  %v2059_v0 = vmov 3  }
  0xde   : > { %679 = vperm.xlu1 %1930, %v2254_v29  }
  0xe4   : > { %1933 = vset.pattern.permute.xlu2 %v2059_v0 }
  0xe5   : > { %703 = vperm.xlu2 %1933, %v2254_v29  }
  0xe6   : > { %1932 = vset.pattern.permute.xlu1 %v2059_v0 }
  0xe7   : > { %700 = vperm.xlu1 %1932, %v2221_v5  }
  0xf8   : > { %v807_v42 = vpop.permute.xlu2 %806 }
  0xf9   : > { %v829_v53 = vmul.f32 %v2235_v15, %v807_v42 }
 0x101   : > { %v893_v48 = vpop.permute.xlu2 %892 }
 0x102   : > { %v918_v50 = vmul.f32 %v2240_v20, %v893_v48 }
 0x107   : > { %v803_v44 = vpop.permute.xlu1 %802  ;;  %v844_v45 = vpop.permute.xlu0 %843 }
 0x108   : > { %v828_v46 = vmul.f32 %v2235_v15, %v803_v44  ;;  %v869_v47 = vmul.f32 %v2237_v16, %v844_v45 }
 0x10a   : > { %v877_v49 = vadd.f32 %v869_v47, %v828_v46  ;;  %v815_v4 = vpop.permute.xlu2 %814 }
 0x10b   : > { %v831_v23 = vmul.f32 %v2235_v15, %v815_v4 }
 0x10c   : > { %v926_v54 = vadd.f32 %v918_v50, %v877_v49 }
 0x10e   : > { %v937_v60 = vadd.f32 %v2251_v27, %v926_v54 }
 0x110   : > { %v897_v51 = vpop.permute.xlu0 %896  ;;  %v945_v3 = vmax.f32 %v937_v60, 0.0 }
 0x111   : > { %v848_v52 = vpop.permute.xlu1 %847  ;;  %v919_v58 = vmul.f32 %v2240_v20, %v897_v51 }
 0x112   : > { %v870_v55 = vmul.f32 %v2237_v16, %v848_v52 }
 0x113   : > { %v856_v18 = vpop.permute.xlu2 %855 }
 0x114   : > { %v878_v57 = vadd.f32 %v870_v55, %v829_v53  ;;  %v872_v24 = vmul.f32 %v2237_v16, %v856_v18 }
 0x116   : > { %v927_v59 = vadd.f32 %v919_v58, %v878_v57  ;;  %v880_v29 = vadd.f32 %v872_v24, %v831_v23  ;;  %v1819_v23 = vld [vmem:[%s2655_s9] sm:$0xff] }
 0x118   : > { %v938_v62 = vadd.f32 %v2251_v27, %v927_v59  ;;  %v901_v63 = vpop.permute.xlu0 %900 }
 0x119   : > { %v920_v25 = vmul.f32 %v2240_v20, %v901_v63 }
 0x11a   : > { %v946_v1 = vmax.f32 %v938_v62, 0.0  ;;  %v811_v2 = vpop.permute.xlu1 %810 }
 0x11b   : > { %v830_v14 = vmul.f32 %v2235_v15, %v811_v2 }
 0x11c   : > { %v956_v6 = vpack.c.bf16 %v946_v1, %v945_v3  ;;  %v823_v41 = vpop.permute.xlu2 %822 }
 0x11d   : > { %v833_v50 = vmul.f32 %v2235_v15, %v823_v41 }
 0x11e   : > { %1781 = vmatmul.msk.bf16.gmra.mxu1 %vm974_vm0, %v956_v6 }
 0x121   : > { %v668_v9 = vpop.permute.xlu0 %667 }
 0x122   : > { %vm670_vm2 = vcmp.eq.s32.totalorder %v668_v9, %v2289_v61 }
 0x123   : > { %v672_v5 = vsel %vm670_vm2, 1.0, %v2060_v7  ;;  %v852_v11 = vpop.permute.xlu1 %851 }
 0x124   : > { %v674_v12 = vpack.c.bf16 %v672_v5, %v672_v5  ;;  %v871_v13 = vmul.f32 %v2237_v16, %v852_v11 }
 0x125   : > { %v864_v47 = vpop.permute.xlu2 %863 }
 0x126   : > { %v714_v19 = vunpack.c.l.b16 %v674_v12  ;;  %v879_v21 = vadd.f32 %v871_v13, %v830_v14  ;;  %v874_v51 = vmul.f32 %v2237_v16, %v864_v47 }
 0x128   : > { %v715_v22 = vpack.c.b16 %v714_v19, %v713_v17  ;;  %v928_v26 = vadd.f32 %v920_v25, %v879_v21  ;;  %v882_v55 = vadd.f32 %v874_v51, %v833_v50  ;;  %v1820_v19 = vld [vmem:[%s2655_s9 + $0x8] sm:$0xff] }
 0x129   : > { %1114 = vmatpush.bf16.msra.mxu2 %v1820_v19 }
 0x12a   : > { %1768 = vmatmul.msk.bf16.vlgmr.msra.gmra.mxu0 %vm737_vm3, %v715_v22  ;;  %v939_v32 = vadd.f32 %v2251_v27, %v928_v26 }
 0x12c   : > { %v905_v28 = vpop.permute.xlu1 %904  ;;  %v947_v36 = vmax.f32 %v939_v32, 0.0  ;;  %v909_v48 = vpop.permute.xlu0 %908 }
 0x12d   : > { %v921_v30 = vmul.f32 %v2240_v20, %v905_v28  ;;  %v922_v52 = vmul.f32 %v2240_v20, %v909_v48  ;;  %v677_v57 = vpop.permute.xlu2 %676  ;;  %1115 = vmatpush.bf16.msra.mxu2 %v1819_v23 }
 0x12e   : > { %vm681_vm4 = vcmp.eq.s32.totalorder %v677_v57, %v2289_v61 }
 0x12f   : > { %v929_v31 = vadd.f32 %v921_v30, %v880_v29  ;;  %v683_v62 = vsel %vm681_vm4, 1.0, %v2060_v7 }
 0x130   : > { %v685_v1 = vpack.c.bf16 %v683_v62, %v683_v62 }
 0x131   : > { %v940_v33 = vadd.f32 %v2251_v27, %v929_v31 }
 0x132   : > { %v718_v3 = vunpack.c.l.b16 %v685_v1 }
 0x133   : > { %v948_v35 = vmax.f32 %v940_v33, 0.0  ;;  %v2370_v33 = vld [vmem:[%s611_s22] sm:$0xff] }
 0x135   : > { %v819_v37 = vpop.permute.xlu1 %818  ;;  %v996_v38 = vpop.f32.mrf.mxu1  ;;  %v957_v39 = vpack.c.bf16 %v948_v35, %v947_v36  ;;  %v2374_v36 = vld [vmem:[%s611_s22 + $0x8] sm:$0xff]  ;;  %s2063_s22 = smov 64  }
 0x136   : > { %v2314_v40 = vadd.f32 %v2311_v34, %v996_v38  ;;  %v832_v46 = vmul.f32 %v2235_v15, %v819_v37  ;;  %v692_v6 = vpop.permute.xlu0 %691  ;;  %v689_v8 = vpop.permute.xlu2 %688 }
 0x137   : > { %1782 = vmatmul.msk.bf16.gmra.mxu1 %vm974_vm0, %v957_v39  ;;  %vm694_vm6 = vcmp.eq.s32.totalorder %v692_v6, %v2289_v61  ;;  %vm693_vm7 = vcmp.eq.s32.totalorder %v689_v8, %v2289_v61 }
 0x138   : > { %1032 = vrot.lane.b32.xlu0 %v2314_v40, %s2061_s3  ;;  %v695_v10 = vsel %vm693_vm7, 1.0, %v2060_v7 }
 0x139   : > { %v697_v11 = vpack.c.bf16 %v695_v10, %v695_v10 }
 0x13b   : > { %v723_v13 = vunpack.c.l.b16 %v697_v11  ;;  %v1951_v11 = vld [vmem:[%s2656_s10] ss:$0 sm:$0xff] }
 0x13d   : > { %v998_v42 = vpop.f32.mrf.mxu1 }
 0x13e   : > { %v860_v43 = vpop.permute.xlu1 %859  ;;  %v2320_v44 = vadd.f32 %v2311_v34, %v998_v42 }
 0x13f   : > { %v873_v45 = vmul.f32 %v2237_v16, %v860_v43  ;;  %v704_v22 = vpop.permute.xlu2 %703 }
 0x140   : > { %1034 = vrot.lane.b32.xlu1 %v2320_v44, %s2061_s3  ;;  %vm706_vm9 = vcmp.eq.s32.totalorder %v704_v22, %v2289_v61 }
 0x141   : > { %v881_v49 = vadd.f32 %v873_v45, %v832_v46  ;;  %v708_v24 = vsel %vm706_vm9, 1.0, %v2060_v7 }
 0x142   : > { %v710_v26 = vpack.c.bf16 %v708_v24, %v708_v24 }
 0x143   : > { %v930_v53 = vadd.f32 %v922_v52, %v881_v49 }
 0x144   : > { %v729_v28 = vunpack.c.l.b16 %v710_v26 }
 0x145   : > { %v941_v59 = vadd.f32 %v2251_v27, %v930_v53 }
 0x147   : > { %v913_v54 = vpop.permute.xlu1 %912  ;;  %v949_v63 = vmax.f32 %v941_v59, 0.0 }
 0x148   : > { %v923_v56 = vmul.f32 %v2240_v20, %v913_v54 }
 0x14a   : > { %v931_v58 = vadd.f32 %v923_v56, %v882_v55 }
 0x14c   : > { %v942_v60 = vadd.f32 %v2251_v27, %v931_v58  ;;  %v696_v27 = vsel %vm694_vm6, 1.0, %v2060_v7 }
 0x14d   : > { %v698_v5 = vpack.c.bf16 %v696_v27, %v696_v27 }
 0x14e   : > { %v950_v15 = vmax.f32 %v942_v60, 0.0 }
 0x14f   : > { %v724_v12 = vunpack.c.l.b16 %v698_v5 }
 0x150   : > { %v680_v16 = vpop.permute.xlu1 %679  ;;  %v958_v0 = vpack.c.bf16 %v950_v15, %v949_v63 }
 0x151   : > { %vm682_vm5 = vcmp.eq.s32.totalorder %v680_v16, %v2289_v61  ;;  %v725_v14 = vpack.c.b16 %v724_v12, %v723_v13 }
 0x152   : > { %v684_v2 = vsel %vm682_vm5, 1.0, %v2060_v7  ;;  %1783 = vmatmul.msk.bf16.gmra.mxu1 %vm974_vm0, %v958_v0 }
 0x153   : > { %v686_v20 = vpack.c.bf16 %v684_v2, %v684_v2 }
 0x155   : > { %v719_v4 = vunpack.c.l.b16 %v686_v20 }
 0x157   : > { %v720_v9 = vpack.c.b16 %v719_v4, %v718_v3 }
 0x159   : > { %1769 = vmatmul.msk.bf16.gmra.mxu0 %vm737_vm3, %v720_v9  ;;  %v701_v17 = vpop.permute.xlu1 %700 }
 0x15a   : > { %vm705_vm8 = vcmp.eq.s32.totalorder %v701_v17, %v2289_v61 }
 0x15b   : > { %v707_v18 = vsel %vm705_vm8, 1.0, %v2060_v7 }
 0x15c   : > { %v709_v21 = vpack.c.bf16 %v707_v18, %v707_v18 }
 0x15e   : > { %v728_v25 = vunpack.c.l.b16 %v709_v21 }
 0x160   : > { %v730_v30 = vpack.c.b16 %v729_v28, %v728_v25 }
 0x169   : > { %1770 = vmatmul.msk.bf16.gmra.mxu0 %vm737_vm3, %v725_v14 }
 0x179   : > { %1771 = vmatmul.msk.bf16.gmra.mxu0 %vm737_vm3, %v730_v30 }
 0x19b   : > { %v1001_v29 = vpop.f32.mrf.mxu1 }
 0x19c   : > { %v2354_v31 = vadd.f32 %v2311_v34, %v1001_v29 }
 0x19e   : > { %1036 = vrot.lane.b32.xlu2 %v2354_v31, %s2061_s3 }
 0x1a3   : > { %v1003_v61 = vpop.f32.mrf.mxu1 }
 0x1a4   : > { %v2360_v32 = vadd.f32 %v2311_v34, %v1003_v61 }
 0x1a6   : > { %1038 = vrot.lane.b32.xlu0 %v2360_v32, %s2061_s3 }
 0x1a7   : > { %v2368_v7 = vpop.f32.mrf.mxu0 }
 0x1a8   : > { %v1016_v35 = vsub.f32 %v2370_v33, %v2368_v7 }
 0x1aa   : > { %v1033_v37 = vpop.permute.xlu0 %1032 }
 0x1ab   : > { %v1056_v41 = vadd.f32 %v1033_v37, %v1016_v35 }
 0x1ad   : > { %v1064_v46 = vmax.f32 %v1056_v41, 0.0 }
 0x1af   : > { %v2376_v38 = vpop.f32.mrf.mxu0 }
 0x1b0   : > { %v1017_v39 = vsub.f32 %v2374_v36, %v2376_v38 }
 0x1b2   : > { %v1035_v42 = vpop.permute.xlu1 %1034 }
 0x1b3   : > { %v1057_v43 = vadd.f32 %v1035_v42, %v1017_v39 }
 0x1b4   : > { %v1006_v45 = vpop.f32.mrf.mxu1 }
 0x1b5   : > { %v1065_v47 = vmax.f32 %v1057_v43, 0.0  ;;  %v2381_v48 = vadd.f32 %v2311_v34, %v1006_v45 }
 0x1b7   : > { %v1076_v49 = vpack.c.bf16 %v1065_v47, %v1064_v46  ;;  %1040 = vrot.lane.b32.xlu1 %v2381_v48, %s2061_s3 }
 0x1b9   : > { %1792 = vmatmul.msk.bf16.vlgmr.msra.gmra.mxu2 %vm974_vm0, %v1076_v49 }
 0x1bc   : > { %v1008_v50 = vpop.f32.mrf.mxu1 }
 0x1bd   : > { %v2387_v51 = vadd.f32 %v2311_v34, %v1008_v50 }
 0x1bf   : > { %1042 = vrot.lane.b32.xlu2 %v2387_v51, %s2061_s3 }
 0x1cf   : > { %v1011_v52 = vpop.f32.mrf.mxu1 }
 0x1d0   : > { %v2392_v53 = vadd.f32 %v2311_v34, %v1011_v52 }
 0x1d2   : > { %1044 = vrot.lane.b32.xlu0 %v2392_v53, %s2061_s3 }
 0x1d6   : > { %v2401_v56 = vpop.f32.mrf.mxu0 }
 0x1d7   : > { %v1013_v54 = vpop.f32.mrf.mxu1  ;;  %v1018_v59 = vsub.f32 %v2370_v33, %v2401_v56 }
 0x1d8   : > { %v2397_v55 = vadd.f32 %v2311_v34, %v1013_v54 }
 0x1da   : > { %1046 = vrot.lane.b32.xlu1 %v2397_v55, %s2061_s3 }
 0x1de   : > { %v2403_v57 = vpop.f32.mrf.mxu0 }
 0x1df   : > { %v1019_v60 = vsub.f32 %v2374_v36, %v2403_v57 }
 0x1e6   : > { %v2409_v63 = vpop.f32.mrf.mxu0 }
 0x1e7   : > { %v1020_v4 = vsub.f32 %v2370_v33, %v2409_v63 }
 0x1ee   : > { %v2412_v2 = vpop.f32.mrf.mxu0 }
 0x1ef   : > { %v1021_v3 = vsub.f32 %v2374_v36, %v2412_v2 }
 0x1f6   : > { %v2425_v14 = vpop.f32.mrf.mxu0 }
 0x1f7   : > { %v1022_v21 = vsub.f32 %v2370_v33, %v2425_v14 }
 0x1f8   : > { %v1037_v58 = vpop.permute.xlu2 %1036 }
 0x1f9   : > { %v1058_v62 = vadd.f32 %v1037_v58, %v1018_v59 }
 0x1fb   : > { %v1066_v16 = vmax.f32 %v1058_v62, 0.0 }
 0x1fe   : > { %v2433_v23 = vpop.f32.mrf.mxu0 }
 0x1ff   : > { %v1023_v25 = vsub.f32 %v2374_v36, %v2433_v23 }
 0x218   : > { %v1039_v15 = vpop.permute.xlu0 %1038 }
 0x219   : > { %v1059_v34 = vadd.f32 %v1039_v15, %v1019_v60  ;;  %v1043_v20 = vpop.permute.xlu2 %1042 }
 0x21a   : > { %v1061_v6 = vadd.f32 %v1043_v20, %v1021_v3 }
 0x21b   : > { %v1067_v0 = vmax.f32 %v1059_v34, 0.0 }
 0x21c   : > { %v1069_v27 = vmax.f32 %v1061_v6, 0.0 }
 0x21d   : > { %v1077_v1 = vpack.c.bf16 %v1067_v0, %v1066_v16 }
 0x21f   : > { %1793 = vmatmul.msk.bf16.gmra.mxu2 %vm974_vm0, %v1077_v1 }
 0x229   : > { %v1041_v8 = vpop.permute.xlu1 %1040 }
 0x22a   : > { %v1060_v9 = vadd.f32 %v1041_v8, %v1020_v4 }
 0x22c   : > { %v1068_v10 = vmax.f32 %v1060_v9, 0.0 }
 0x22e   : > { %v1078_v5 = vpack.c.bf16 %v1069_v27, %v1068_v10 }
 0x230   : > { %1794 = vmatmul.msk.bf16.gmra.mxu2 %vm974_vm0, %v1078_v5 }
 0x23c   : > { %v1117_v12 = vpop.f32.mrf.mxu2 }
 0x23d   : > { %v1118_v13 = vadd.f32 %v1951_v11, %v1117_v12 }
 0x23f   : > { %v1137_v17 = vmul.f32 0.17677669, %v1118_v13 }
 0x241   : > { %1226 = vst.msk [vmem:[%s2427_s20] sm:$0xff] %vm974_vm0, %v1137_v17 }
 0x244   : > { %v1119_v18 = vpop.f32.mrf.mxu2  ;;  %v1045_v24 = vpop.permute.xlu0 %1044 }
 0x245   : > { %v1120_v19 = vadd.f32 %v1951_v11, %v1119_v18  ;;  %v1062_v26 = vadd.f32 %v1045_v24, %v1022_v21 }
 0x247   : > { %v1138_v22 = vmul.f32 0.17677669, %v1120_v19  ;;  %v1070_v30 = vmax.f32 %v1062_v26, 0.0 }
 0x249   : > { %1227 = vst.msk [vmem:[%s2427_s20 + $0x8] sm:$0xff] %vm974_vm0, %v1138_v22 }
 0x24c   : > { %v1047_v28 = vpop.permute.xlu1 %1046 }
 0x24d   : > { %v1063_v29 = vadd.f32 %v1047_v28, %v1023_v25 }
 0x24f   : > { %v1071_v61 = vmax.f32 %v1063_v29, 0.0 }
 0x251   : > { %v1079_v35 = vpack.c.bf16 %v1071_v61, %v1070_v30 }
 0x253   : > { %1795 = vmatmul.msk.bf16.gmra.mxu2 %vm974_vm0, %v1079_v35 }
 0x2a2   : > { %v1122_v37 = vpop.f32.mrf.mxu2 }
 0x2a3   : > { %v1123_v39 = vadd.f32 %v1951_v11, %v1122_v37 }
 0x2a5   : > { %v1139_v33 = vmul.f32 0.17677669, %v1123_v39 }
 0x2a7   : > { %1230 = vrot.lane.b32.xlu2 %v1139_v33, %s2062_s27  ;;  %v1239_v54 = vmax.f32 %v1137_v17, %v1139_v33 }
 0x2aa   : > { %v1124_v41 = vpop.f32.mrf.mxu2 }
 0x2ab   : > { %v1125_v42 = vadd.f32 %v1951_v11, %v1124_v41 }
 0x2ad   : > { %v1140_v43 = vmul.f32 0.17677669, %v1125_v42 }
 0x2af   : > { %1232 = vrot.lane.b32.xlu0 %v1140_v43, %s2062_s27  ;;  %v1240_v34 = vmax.f32 %v1138_v22, %v1140_v43 }
 0x2b3   : > { %v1127_v36 = vpop.f32.mrf.mxu2 }
 0x2b4   : > { %v1128_v45 = vadd.f32 %v1951_v11, %v1127_v36 }
 0x2b6   : > { %v1141_v46 = vmul.f32 0.17677669, %v1128_v45 }
 0x2b8   : > { %1243 = vrot.lane.b32.xlu1 %v1141_v46, %s2063_s22  ;;  %v1252_v59 = vmax.f32 %v1239_v54, %v1141_v46 }
 0x2bb   : > { %v1129_v47 = vpop.f32.mrf.mxu2 }
 0x2bc   : > { %v1130_v49 = vadd.f32 %v1951_v11, %v1129_v47 }
 0x2be   : > { %v1142_v50 = vmul.f32 0.17677669, %v1130_v49 }
 0x2c0   : > { %1245 = vrot.lane.b32.xlu2 %v1142_v50, %s2063_s22  ;;  %v1253_v0 = vmax.f32 %v1240_v34, %v1142_v50 }
 0x2d6   : > { %v1132_v52 = vpop.f32.mrf.mxu2 }
 0x2d7   : > { %v1133_v58 = vadd.f32 %v1951_v11, %v1132_v52 }
 0x2d9   : > { %v1143_v60 = vmul.f32 0.17677669, %v1133_v58 }
 0x2db   : > { %v1265_v62 = vmax.f32 %v1252_v59, %v1143_v60  ;;  %1256 = vrot.lane.b32.xlu0 %v1143_v60, %s2061_s3 }
 0x2dd   : > { %1283 = vrot.lane.b32.xlu2 %v1265_v62, %s2062_s27 }
 0x2de   : > { %v1134_v15 = vpop.f32.mrf.mxu2 }
 0x2df   : > { %v1135_v16 = vadd.f32 %v1951_v11, %v1134_v15 }
 0x2e1   : > { %v1144_v1 = vmul.f32 0.17677669, %v1135_v16 }
 0x2e3   : > { %v1266_v20 = vmax.f32 %v1253_v0, %v1144_v1  ;;  %1258 = vrot.lane.b32.xlu1 %v1144_v1, %s2061_s3 }
 0x2e5   : > { %1285 = vrot.lane.b32.xlu0 %v1266_v20, %s2062_s27  ;;  %1311 = vrot.lane.b32.xlu2 %v1266_v20, %s2063_s22 }
 0x2eb   : > { %1309 = vrot.lane.b32.xlu1 %v1265_v62, %s2063_s22 }
 0x2ed   : > { %1335 = vrot.lane.b32.xlu0 %v1265_v62, %s2061_s3  ;;  %1149 = vrot.lane.b32.xlu2 %v2354_v31, %s2062_s27 }
 0x2f3   : > { %1337 = vrot.lane.b32.xlu1 %v1266_v20, %s2061_s3 }
 0x2f5   : > { %1151 = vrot.lane.b32.xlu0 %v2360_v32, %s2062_s27  ;;  %1155 = vrot.lane.b32.xlu2 %v2387_v51, %s2062_s27 }
 0x2fb   : > { %1153 = vrot.lane.b32.xlu1 %v2381_v48, %s2062_s27 }
 0x2fd   : > { %1157 = vrot.lane.b32.xlu0 %v2392_v53, %s2062_s27 }
 0x301   : > { %v1231_v3 = vpop.permute.xlu2 %1230 }
 0x302   : > { %1237 = vst.msk [vmem:[%s2427_s20] sm:$0xff] %vm1236_vm10, %v1231_v3 }
 0x303   : > { %1159 = vrot.lane.b32.xlu1 %v2397_v55, %s2062_s27 }
 0x31a   : > { %v1246_v32 = vpop.permute.xlu2 %1245 }
 0x321   : > { %v1233_v31 = vpop.permute.xlu0 %1232 }
 0x322   : > { %1238 = vst.msk [vmem:[%s2427_s20 + $0x8] sm:$0xff] %vm1236_vm10, %v1233_v31 }
 0x323   : > { %1251 = vst.msk [vmem:[%s2427_s20 + $0x8] sm:$0xff] %vm1249_vm11, %v1246_v32 }
 0x32a   : > { %v1244_v48 = vpop.permute.xlu1 %1243 }
 0x32b   : > { %1250 = vst.msk [vmem:[%s2427_s20] sm:$0xff] %vm1249_vm11, %v1244_v48 }
 0x337   : > { %v1284_v11 = vpop.permute.xlu2 %1283 }
 0x33f   : > { %v1312_v61 = vpop.permute.xlu2 %1311 }
 0x347   : > { %v1150_v41 = vpop.permute.xlu2 %1149 }
 0x348   : > { %v1171_v46 = vadd.f32 %v1150_v41, %v2401_v56 }
 0x34a   : > { %v1179_v49 = vpack.c.bf16 %v1171_v46, %v1171_v46 }
 0x34d   : > { %v1257_v51 = vpop.permute.xlu0 %1256 }
 0x34e   : > { %1263 = vst.msk [vmem:[%s2427_s20] sm:$0xff] %vm1262_vm12, %v1257_v51 }
 0x34f   : > { %v1156_v52 = vpop.permute.xlu2 %1155 }
 0x355   : > { %v1267_v53 = vld [vmem:[%s2427_s20] sm:$0xff]  ;;  %v1259_v55 = vpop.permute.xlu1 %1258 }
 0x356   : > { %v1269_v4 = vsub.f32 %v1267_v53, %v1265_v62  ;;  %1264 = vst.msk [vmem:[%s2427_s20 + $0x8] sm:$0xff] %vm1262_vm12, %v1259_v55  ;;  %v1174_v62 = vadd.f32 %v1156_v52, %v2412_v2 }
 0x357   : > { %v1286_v18 = vpop.permute.xlu0 %1285 }
 0x358   : > { %v1271_v6 = vmul.f32 1.442695, %v1269_v4  ;;  %v1182_v34 = vpack.c.bf16 %v1174_v62, %v1174_v62 }
 0x35a   : > { %1953 = vpow2.f32 %v1271_v6 }
 0x35d   : > { %v1268_v8 = vld [vmem:[%s2427_s20 + $0x8] sm:$0xff]  ;;  %v1310_v26 = vpop.permute.xlu1 %1309 }
 0x35e   : > { %v1270_v9 = vsub.f32 %v1268_v8, %v1266_v20 }
 0x35f   : > { %v1336_v42 = vpop.permute.xlu0 %1335 }
 0x360   : > { %v2478_v27 = vpop.eup %1953  ;;  %v1273_v10 = vmul.f32 1.442695, %v1270_v9 }
 0x361   : > { %1275 = vst.msk [vmem:[%s2427_s20] sm:$0xff] %vm974_vm0, %v2478_v27 }
 0x362   : > { %1955 = vpow2.f32 %v1273_v10 }
 0x365   : > { %v1338_v50 = vpop.permute.xlu1 %1337 }
 0x367   : > { %v1152_v59 = vpop.permute.xlu0 %1151 }
 0x368   : > { %v2483_v5 = vpop.eup %1955  ;;  %v1279_v12 = vld [vmem:[%s2427_s20] sm:$0xff]  ;;  %v1172_v56 = vadd.f32 %v1152_v59, %v2403_v57 }
 0x369   : > { %v1289_v13 = vsub.f32 %v1279_v12, %v1284_v11  ;;  %1276 = vst.msk [vmem:[%s2427_s20 + $0x8] sm:$0xff] %vm974_vm0, %v2483_v5 }
 0x36a   : > { %v1180_v0 = vpack.c.bf16 %v1172_v56, %v1172_v56 }
 0x36b   : > { %v1291_v17 = vmul.f32 1.442695, %v1289_v13 }
 0x36d   : > { %1957 = vpow2.f32 %v1291_v17  ;;  %v1154_v16 = vpop.permute.xlu1 %1153 }
 0x36e   : > { %v1173_v2 = vadd.f32 %v1154_v16, %v2409_v63 }
 0x36f   : > { %v1158_v20 = vpop.permute.xlu0 %1157 }
 0x370   : > { %v1280_v19 = vld [vmem:[%s2427_s20 + $0x8] sm:$0xff]  ;;  %v1175_v3 = vadd.f32 %v1158_v20, %v2425_v14  ;;  %v1181_v31 = vpack.c.bf16 %v1173_v2, %v1173_v2 }
 0x371   : > { %v1290_v21 = vsub.f32 %v1280_v19, %v1286_v18 }
 0x372   : > { %v1183_v32 = vpack.c.bf16 %v1175_v3, %v1175_v3 }
 0x373   : > { %v1958_v22 = vpop.eup %1957  ;;  %v1293_v24 = vmul.f32 1.442695, %v1290_v21 }
 0x374   : > { %1295 = vst.msk [vmem:[%s2427_s20] sm:$0xff] %vm1236_vm10, %v1958_v22  ;;  %1299 = vrot.lane.b32.xlu2 %v1958_v22, %s2061_s3 }
 0x375   : > { %1959 = vpow2.f32 %v1293_v24  ;;  %v1160_v57 = vpop.permute.xlu1 %1159 }
 0x376   : > { %v1176_v48 = vadd.f32 %v1160_v57, %v2433_v23 }
 0x378   : > { %v1184_v51 = vpack.c.bf16 %v1176_v48, %v1176_v48 }
 0x37b   : > { %v1960_v25 = vpop.eup %1959  ;;  %v1307_v28 = vld [vmem:[%s2427_s20] sm:$0xff] }
 0x37c   : > { %1296 = vst.msk [vmem:[%s2427_s20 + $0x8] sm:$0xff] %vm1236_vm10, %v1960_v25  ;;  %v1315_v29 = vsub.f32 %v1307_v28, %v1310_v26  ;;  %1301 = vrot.lane.b32.xlu0 %v1960_v25, %s2061_s3 }
 0x37e   : > { %v1317_v30 = vmul.f32 1.442695, %v1315_v29 }
 0x380   : > { %1961 = vpow2.f32 %v1317_v30 }
 0x383   : > { %v1308_v35 = vld [vmem:[%s2427_s20 + $0x8] sm:$0xff] }
 0x384   : > { %v1316_v37 = vsub.f32 %v1308_v35, %v1312_v61 }
 0x386   : > { %v1962_v39 = vpop.eup %1961  ;;  %v1319_v33 = vmul.f32 1.442695, %v1316_v37 }
 0x387   : > { %1321 = vst.msk [vmem:[%s2427_s20] sm:$0xff] %vm1249_vm11, %v1962_v39  ;;  %1325 = vrot.lane.b32.xlu1 %v1962_v39, %s2063_s22 }
 0x388   : > { %1963 = vpow2.f32 %v1319_v33 }
 0x38e   : > { %v1964_v43 = vpop.eup %1963  ;;  %v1333_v36 = vld [vmem:[%s2427_s20] sm:$0xff] }
 0x38f   : > { %1322 = vst.msk [vmem:[%s2427_s20 + $0x8] sm:$0xff] %vm1249_vm11, %v1964_v43  ;;  %v1341_v45 = vsub.f32 %v1333_v36, %v1336_v42  ;;  %1327 = vrot.lane.b32.xlu2 %v1964_v43, %s2063_s22 }
 0x391   : > { %v1343_v47 = vmul.f32 1.442695, %v1341_v45 }
 0x393   : > { %1965 = vpow2.f32 %v1343_v47 }
 0x396   : > { %v1334_v54 = vld [vmem:[%s2427_s20 + $0x8] sm:$0xff] }
 0x397   : > { %v1342_v58 = vsub.f32 %v1334_v54, %v1338_v50  ;;  %1197 = vrot.lane.b32.xlu2 %v1179_v49, %s2061_s3 }
 0x399   : > { %v1966_v60 = vpop.eup %1965  ;;  %v1345_v15 = vmul.f32 1.442695, %v1342_v58 }
 0x39a   : > { %1347 = vst.msk [vmem:[%s2427_s20] sm:$0xff] %vm1262_vm12, %v1966_v60  ;;  %1351 = vrot.lane.b32.xlu0 %v1966_v60, %s2062_s27 }
 0x39b   : > { %1967 = vpow2.f32 %v1345_v15 }
 0x39f   : > { %1203 = vrot.lane.b32.xlu2 %v1182_v34, %s2061_s3 }
 0x3a1   : > { %v1968_v1 = vpop.eup %1967  ;;  %v1361_v19 = vld [vmem:[%s2427_s20] sm:$0xff] }
 0x3a2   : > { %1348 = vst.msk [vmem:[%s2427_s20 + $0x8] sm:$0xff] %vm1262_vm12, %v1968_v1  ;;  %1353 = vrot.lane.b32.xlu1 %v1968_v1, %s2062_s27  ;;  %1199 = vrot.lane.b32.xlu0 %v1180_v0, %s2061_s3 }
 0x3a9   : > { %v1362_v24 = vld [vmem:[%s2427_s20 + $0x8] sm:$0xff] }
 0x3aa   : > { %1201 = vrot.lane.b32.xlu1 %v1181_v31, %s2061_s3  ;;  %1205 = vrot.lane.b32.xlu0 %v1183_v32, %s2061_s3 }
 0x3b2   : > { %1207 = vrot.lane.b32.xlu1 %v1184_v51, %s2061_s3 }
 0x3ba   : > { %1145 = vrot.lane.b32.xlu1 %v2314_v40, %s2062_s27 }
 0x3ce   : > { %v1300_v53 = vpop.permute.xlu2 %1299 }
 0x3cf   : > { %v1305_v23 = vadd.f32 %v2478_v27, %v1300_v53 }
 0x3e9   : > { %v1328_v55 = vpop.permute.xlu2 %1327 }
 0x3ee   : > { %v1302_v4 = vpop.permute.xlu0 %1301 }
 0x3ef   : > { %v1306_v40 = vadd.f32 %v2483_v5, %v1302_v4 }
 0x3f1   : > { %v1198_v63 = vpop.permute.xlu2 %1197  ;;  %v1332_v11 = vadd.f32 %v1328_v55, %v1306_v40 }
 0x3f2   : > { %1220 = vst.msk [vmem:[#allocation2 + $0x8] sm:$0xf] %vm1217_vm13, %v1198_v63 }
 0x3f9   : > { %v1204_v14 = vpop.permute.xlu2 %1203  ;;  %v1326_v6 = vpop.permute.xlu1 %1325 }
 0x3fa   : > { %1223 = vst.msk [vmem:[#allocation2 + $0x14] sm:$0xf] %vm1217_vm13, %v1204_v14  ;;  %v1331_v8 = vadd.f32 %v1326_v6, %v1305_v23 }
 0x40c   : > { %v1352_v9 = vpop.permute.xlu0 %1351 }
 0x40d   : > { %v1357_v10 = vadd.f32 %v1352_v9, %v1331_v8 }
 0x40f   : > { %1969 = vrcp.f32 %v1357_v10 }
 0x414   : > { %v1354_v12 = vpop.permute.xlu1 %1353  ;;  %v1200_v13 = vpop.permute.xlu0 %1199 }
 0x415   : > { %v1970_v17 = vpop.eup %1969  ;;  %v1358_v18 = vadd.f32 %v1354_v12, %v1332_v11  ;;  %1221 = vst.msk [vmem:[#allocation2 + $0xc] sm:$0xf] %vm1217_vm13, %v1200_v13  ;;  %v1822_v13 = vld [vmem:[%s2657_s11 + $0x8] sm:$0xff] }
 0x416   : > { %1379 = vrot.lane.b32.xlu2 %v1970_v17, %s2062_s27  ;;  %v2533_v27 = vmul.f32 %v1970_v17, %v1361_v19  ;;  %1518 = vmatpush.bf16.msra.mxu3 %v1822_v13 }
 0x417   : > { %1971 = vrcp.f32 %v1358_v18 }
 0x418   : > { %1365 = vst.msk [vmem:[%s2427_s20] sm:$0xff] %vm974_vm0, %v2533_v27 }
 0x41c   : > { %v1202_v5 = vpop.permute.xlu1 %1201  ;;  %v1206_v21 = vpop.permute.xlu0 %1205  ;;  %v1829_v25 = vld [vmem:[#allocation2 + $0x8] sm:$0xff]  }
 0x41d   : > { %v1972_v22 = vpop.eup %1971  ;;  %1222 = vst.msk [vmem:[#allocation2 + $0x10] sm:$0xf] %vm1217_vm13, %v1202_v5  ;;  %v1830_v28 = vunpack.c.l.bf16 %v1829_v25  ;;  %v1831_v29 = vunpack.c.h.bf16 %v1829_v25 }
 0x41e   : > { %1224 = vst.msk [vmem:[#allocation2 + $0x18] sm:$0xf] %vm1217_vm13, %v1206_v21  ;;  %1418 = vrot.lane.b32.xlu1 %v1972_v22, %s2063_s22  ;;  %1381 = vrot.lane.b32.xlu0 %v1972_v22, %s2062_s27  ;;  %v2543_v26 = vmul.f32 %v1972_v22, %v1362_v24 }
 0x41f   : > { %1147 = vrot.lane.b32.xlu2 %v2320_v44, %s2062_s27  ;;  %v1934_v61 = vpack.i.bf16 %v1831_v29, %v1830_v28  ;;  %v1375_v49 = vld [vmem:[%s2427_s20] sm:$0xff] }
 0x420   : > { %1366 = vst.msk [vmem:[%s2427_s20 + $0x8] sm:$0xff] %vm974_vm0, %v2543_v26 }
 0x424   : > { %v1208_v30 = vpop.permute.xlu1 %1207  ;;  %v1833_v35 = vld [vmem:[#allocation2 + $0x10] sm:$0xff]  }
 0x425   : > { %1225 = vst.msk [vmem:[#allocation2 + $0x1c] sm:$0xf] %vm1217_vm13, %v1208_v30  ;;  %v1834_v37 = vunpack.c.l.bf16 %v1833_v35  ;;  %v1835_v39 = vunpack.c.h.bf16 %v1833_v35 }
 0x426   : > { %1453 = vrot.lane.b32.xlu1 %v1970_v17, %s2061_s3  ;;  %1416 = vrot.lane.b32.xlu0 %v1970_v17, %s2063_s22  ;;  %v1821_v17 = vld [vmem:[%s2657_s11] sm:$0xff] }
 0x427   : > { %1935 = vrot.lane.b32.xlu2 %v1934_v61, %s2062_s27  ;;  %v1939_v33 = vpack.i.bf16 %v1835_v39, %v1834_v37  ;;  %v1376_v62 = vld [vmem:[%s2427_s20 + $0x8] sm:$0xff]  ;;  %1519 = vmatpush.bf16.msra.mxu3 %v1821_v17 }
 0x42c   : > { %v1146_v44 = vpop.permute.xlu1 %1145  ;;  %v1837_v42 = vld [vmem:[#allocation2 + $0x18] sm:$0xff]  }
 0x42d   : > { %v1169_v41 = vadd.f32 %v1146_v44, %v2368_v7  ;;  %v1838_v36 = vunpack.c.l.bf16 %v1837_v42  ;;  %v1839_v45 = vunpack.c.h.bf16 %v1837_v42 }
 0x42e   : > { %1940 = vrot.lane.b32.xlu0 %v1939_v33, %s2063_s22 }
 0x42f   : > { %v1177_v43 = vpack.c.bf16 %v1169_v41, %v1169_v41  ;;  %1455 = vrot.lane.b32.xlu2 %v1972_v22, %s2061_s3  ;;  %v1944_v46 = vpack.i.bf16 %v1839_v45, %v1838_v36 }
 0x431   : > { %1193 = vrot.lane.b32.xlu1 %v1177_v43, %s2061_s3 }
 0x436   : > { %1945 = vrot.lane.b32.xlu0 %v1944_v46, %s2061_s3 }
 0x470   : > { %v1380_v47 = vpop.permute.xlu2 %1379 }
 0x471   : > { %v1385_v50 = vmul.f32 %v1380_v47, %v1375_v49 }
 0x473   : > { %1387 = vst.msk [vmem:[%s2427_s20] sm:$0xff] %vm1236_vm10, %v1385_v50 }
 0x479   : > { %v1148_v7 = vpop.permute.xlu2 %1147 }
 0x47a   : > { %v1170_v52 = vadd.f32 %v1148_v7, %v2376_v38  ;;  %v1414_v1 = vld [vmem:[%s2427_s20] sm:$0xff] }
 0x47c   : > { %v1178_v54 = vpack.c.bf16 %v1170_v52, %v1170_v52 }
 0x47e   : > { %1195 = vrot.lane.b32.xlu2 %v1178_v54, %s2061_s3 }
 0x481   : > { %v1936_v58 = vpop.permute.xlu2 %1935 }
 0x482   : > { %v1937_v59 = vunpack.i.l.bf16 %v1936_v58  ;;  %v1938_v56 = vunpack.i.h.bf16 %v1936_v58 }
 0x484   : > { %v1402_v60 = vmul.f32 %v1937_v59, %v1385_v50 }
 0x486   : > { %1406 = vrot.lane.b32.xlu0 %v1402_v60, %s2061_s3 }
 0x489   : > { %v1456_v4 = vpop.permute.xlu2 %1455 }
 0x490   : > { %v1382_v15 = vpop.permute.xlu0 %1381  ;;  %v1419_v34 = vpop.permute.xlu1 %1418 }
 0x491   : > { %v1386_v16 = vmul.f32 %v1382_v15, %v1376_v62 }
 0x493   : > { %1388 = vst.msk [vmem:[%s2427_s20 + $0x8] sm:$0xff] %vm1236_vm10, %v1386_v16  ;;  %v1403_v38 = vmul.f32 %v1938_v56, %v1386_v16 }
 0x495   : > { %1408 = vrot.lane.b32.xlu1 %v1403_v38, %s2061_s3 }
 0x498   : > { %v1417_v0 = vpop.permute.xlu0 %1416  ;;  %v1454_v3 = vpop.permute.xlu1 %1453 }
 0x499   : > { %v1422_v20 = vmul.f32 %v1417_v0, %v1414_v1 }
 0x49a   : > { %v1415_v2 = vld [vmem:[%s2427_s20 + $0x8] sm:$0xff] }
 0x49b   : > { %1424 = vst.msk [vmem:[%s2427_s20] sm:$0xff] %vm1249_vm11, %v1422_v20  ;;  %v1423_v31 = vmul.f32 %v1419_v34, %v1415_v2 }
 0x49d   : > { %1425 = vst.msk [vmem:[%s2427_s20 + $0x8] sm:$0xff] %vm1249_vm11, %v1423_v31 }
 0x4a0   : > { %v1941_v32 = vpop.permute.xlu0 %1940 }
 0x4a1   : > { %v1943_v57 = vunpack.i.h.bf16 %v1941_v32  ;;  %v1942_v48 = vunpack.i.l.bf16 %v1941_v32 }
 0x4a2   : > { %v1451_v51 = vld [vmem:[%s2427_s20] sm:$0xff] }
 0x4a3   : > { %v1440_v53 = vmul.f32 %v1943_v57, %v1423_v31  ;;  %v1439_v55 = vmul.f32 %v1942_v48, %v1422_v20  ;;  %v1194_v63 = vpop.permute.xlu1 %1193  ;;  %v1459_v14 = vmul.f32 %v1454_v3, %v1451_v51 }
 0x4a4   : > { %1218 = vst.msk [vmem:[#allocation2] sm:$0xf] %vm1217_vm13, %v1194_v63  ;;  %v1452_v6 = vld [vmem:[%s2427_s20 + $0x8] sm:$0xff] }
 0x4a5   : > { %1445 = vrot.lane.b32.xlu0 %v1440_v53, %s2063_s22  ;;  %1443 = vrot.lane.b32.xlu2 %v1439_v55, %s2063_s22  ;;  %v1460_v23 = vmul.f32 %v1456_v4, %v1452_v6  ;;  %1461 = vst.msk [vmem:[%s2427_s20] sm:$0xff] %vm1262_vm12, %v1459_v14 }
 0x4a7   : > { %1462 = vst.msk [vmem:[%s2427_s20 + $0x8] sm:$0xff] %vm1262_vm12, %v1460_v23 }
 0x4a8   : > { %v1946_v8 = vpop.permute.xlu0 %1945 }
 0x4a9   : > { %v1948_v9 = vunpack.i.h.bf16 %v1946_v8  ;;  %v1947_v10 = vunpack.i.l.bf16 %v1946_v8 }
 0x4ab   : > { %v1477_v40 = vmul.f32 %v1948_v9, %v1460_v23  ;;  %v1476_v11 = vmul.f32 %v1947_v10, %v1459_v14 }
 0x4ad   : > { %1482 = vrot.lane.b32.xlu2 %v1477_v40, %s2062_s27  ;;  %1480 = vrot.lane.b32.xlu1 %v1476_v11, %s2062_s27  ;;  %s1823_s27 = sshll.u32 %s2043_s16, 4  ;;  %s1993_s16 = scalar_lea.hbm %s2660_s14, 32 }
 0x4ae   : > { %s1560_s21 = scalar_lea.hbm %s2660_s14, %s1823_s27 }
 0x4af   : > { %s1563_s19 = sshll.u32 %s1560_s21, 4  ;;  %s1564_s19 = int_to_ptr.hbm [resolvable:$true] %s1563_s19 }
 0x4b0   : > { %s1987_s2 = sshra.s32 %s1564_s19, 4  ;;  %s1988_s2 = int_to_ptr.hbm [resolvable:$true] %s1987_s2 }
 0x4b1   : > { %s1989_s4 = scalar_lea.hbm %s1988_s2, 16  ;;  %p1994_p1 = scmp.lt.s32.totalorder %s1988_s2, %s2660_s14 }
 0x4b2   : > { %p1990_p12 = scmp.ne.s32.totalorder %s1988_s2, %s1989_s4  ;;  %p1995_p2 = scmp.lt.s32.totalorder %s1993_s16, %s1989_s4 }
 0x4b4   : > { %p1991_p13 = pnand %p1990_p12, %p2181_p4  ;;  %p1996_p3 = por %p1995_p2, %p1994_p1 }
 0x4b6   : > { %p1992_p0 = pneg %p1991_p13 }
 0x4b8   : > { %p1997_p5 = pnand %p1996_p3, %p1992_p0 }
 0x4d8   : > { %v1196_v12 = vpop.permute.xlu2 %1195 }
 0x4d9   : > { %1219 = vst.msk [vmem:[#allocation2 + $0x4] sm:$0xf] %vm1217_vm13, %v1196_v12 }
 0x4e0   : > { %v1825_v18 = vld [vmem:[#allocation2] sm:$0xff]  }
 0x4e1   : > { %v1827_v5 = vunpack.c.h.bf16 %v1825_v18  ;;  %v1826_v22 = vunpack.c.l.bf16 %v1825_v18 }
 0x4e3   : > { %v1372_v25 = vmul.f32 %v1827_v5, %v2543_v26  ;;  %v1371_v29 = vmul.f32 %v1826_v22, %v2533_v27 }
 0x4f8   : > { %v1407_v19 = vpop.permute.xlu0 %1406 }
 0x4f9   : > { %v1412_v61 = vadd.f32 %v1407_v19, %v1371_v29 }
 0x4ff   : > { %v1444_v21 = vpop.permute.xlu2 %1443 }
 0x500   : > { %v1449_v37 = vadd.f32 %v1444_v21, %v1412_v61 }
 0x507   : > { %v1409_v24 = vpop.permute.xlu1 %1408  ;;  %v1483_v39 = vpop.permute.xlu2 %1482 }
 0x508   : > { %v1413_v30 = vadd.f32 %v1409_v24, %v1372_v25 }
 0x517   : > { %v1446_v28 = vpop.permute.xlu0 %1445 }
 0x518   : > { %v1450_v35 = vadd.f32 %v1446_v28, %v1413_v30 }
 0x51a   : > { %v1487_v33 = vadd.f32 %v1483_v39, %v1450_v35 }
 0x51f   : > { %v1481_v44 = vpop.permute.xlu1 %1480 }
 0x520   : > { %v1486_v41 = vadd.f32 %v1481_v44, %v1449_v37 }
 0x522   : > { %v1492_v42 = vpack.c.bf16 %v1487_v33, %v1486_v41 }
 0x524   : > { %1804 = vmatmul.msk.bf16.vlgmr.msra.gmra.mxu3 %vm974_vm0, %v1492_v42 }
 0x525   : > { %2000 = shalt.err (!%p1997_p5)
}
 0x526   : > { %s2064_s17 = smov 128   ;;  %s2065_s20 = smov 8   ;;  %v1952_v27 = vld [vmem:[%s2658_s12] ss:$0 sm:$0xff]  ;;  %vm1530_vm14 = vcmask 64512  }
 0x527   : > { %1840 = dma.vmem_to_hbm [thread:$0]  (%p2181_p4), %s1562_s24, 256, %s1564_s19, %s1543_s1, %s2064_s17, %s2064_s17, %s2065_s20  }
 0x528   : > { %s601_s5 = scalar_lea.vmem %s2646_s0, %s2204_s28  ;;  %s646_s7 = scalar_lea.vmem %s2659_s13, %s2204_s28 }
 0x529   : > { %v1526_v43 = vld [vmem:[%s601_s5] sm:$0xff]  ;;  %v1527_v47 = vld [vmem:[%s601_s5 + $0x8] sm:$0xff] }
 0x5a7   : > { %v1521_v26 = vpop.f32.mrf.mxu3 }
 0x5a8   : > { %v1522_v36 = vadd.f32 %v1952_v27, %v1521_v26 }
 0x5aa   : > { %v1528_v45 = vadd.f32 %v1526_v43, %v1522_v36 }
 0x5ac   : > { %1531 = vst.msk [vmem:[%s646_s7] sm:$0xff] %vm1530_vm14, %v1528_v45 }
 0x5af   : > { %v1523_v46 = vpop.f32.mrf.mxu3 }
 0x5b0   : > { %v1524_v49 = vadd.f32 %v1952_v27, %v1523_v46 }
 0x5b2   : > { %v1529_v50 = vadd.f32 %v1527_v47, %v1524_v49 }
 0x5b4   : > { %1532 = vst.msk [vmem:[%s646_s7 + $0x8] sm:$0xff] %vm1530_vm14, %v1529_v50 }
 0x5b5 PF: > { %p1846_p4 = scmp.ge.s32.totalorder %s2051_s18, 2  ;;  %s1590_s1 = sand.u32 1, %s2031_s29  }
 0x5b6   : > { %s1591_s23 = scalar_lea.sflag [#allocation4], %s1590_s1 }
 0x5b7   : > { %p1843_p6 = pnand %p1846_p4, %p2188_p8 }
 0x5b9   : > { %p1844_p7 = pneg %p1843_p6 }
 0x5bb   : > { %2026 = dma.done.wait (%p1844_p7), %s1591_s23, 256  }
 0x5bc   : > { %2028 = vsyncadd (%p1844_p7), %s1591_s23, 4294967040  ;;  %s28_s18 = sadd.s32 1, %s2051_s18   ;;  %s2681_s16 = sld [smem:[#allocation6_spill]] }
 0x5bd   : > { %p25_p9 = scmp.ge.s32.totalorder %s28_s18, 4   ;;  %s2682_s17 = sld [smem:[#allocation7_spill]] }
 0x5be   : > { %s2683_s29 = smov %s2035_s30  ;;  %s2684_s30 = smov %s2039_s15 }
 0x5bf   : > { %s2685_s15 = smov %s2194_s26  ;;  %27 = sbr.rel (!%p25_p9) target bundleno = 12 (0xc), region = 134 }
 0x5c4   :  { %1597 = vsyncpa [#allocation4], 1 }
 0x5c5   :  { %1599 = vsyncpa [#allocation4 + $0x1], 1 }

</bundles_post_ra>
